<compile_context>
chip_gen: v6e
topology: v6e:2x2x1
jax: 0.10.0
libtpu: 0.0.40
codegen_flags: <defaults>
</compile_context>

<pallas_src>
import functools

import jax
import jax.numpy as jnp
from jax.experimental import pallas as pl
from jax.experimental.pallas import tpu as pltpu

_LN_EPS = 1e-5  # torch.nn.LayerNorm default


def _round_up(x, m):
    return ((x + m - 1) // m) * m


def _vmem_limit(block_bytes, floor=32 * 2**20, cap=64 * 2**20):
    # Explicit scoped-VMEM request with ~50% headroom for double buffers;
    # capped at 64 MiB so the request never exceeds v7x physical VMEM.
    return int(min(max(int(block_bytes * 1.5), floor), cap))


# ----------------------------------------------------------------------------
# In-kernel helpers
# ----------------------------------------------------------------------------
def _layernorm(y, gamma, beta):
    mu = jnp.mean(y, axis=-1, keepdims=True)
    var = jnp.mean(jnp.square(y - mu), axis=-1, keepdims=True)
    return (y - mu) * jax.lax.rsqrt(var + _LN_EPS) * gamma + beta


# ----------------------------------------------------------------------------
# Kernel 1: edge MLP + Tanh + LayerNorm + fused edge residual.
# ----------------------------------------------------------------------------
def _edge_mlp_kernel(ea_ref, xr_ref, xs_ref,
                     w1a, w1b, w1c, b1, w2, b2, w3, b3, gamma, beta,
                     msg_ref, eupd_ref):
    """messages = LN(MLP([edge_attr, x[recv], x[send]])); eupd = edge_attr + messages."""
    ea = ea_ref[...]
    # TODO(synk): fuse the three K=32 matmuls into one K=96 matmul via a VMEM
    # scratch concat (review item 6); split form kept because the kernel is
    # memory/overhead bound at D=H=32 and the sum is mathematically identical.
    h = jnp.tanh(
        jnp.dot(ea, w1a[...], preferred_element_type=jnp.float32)
        + jnp.dot(xr_ref[...], w1b[...], preferred_element_type=jnp.float32)
        + jnp.dot(xs_ref[...], w1c[...], preferred_element_type=jnp.float32)
        + b1[...])
    h = jnp.tanh(jnp.dot(h, w2[...], preferred_element_type=jnp.float32)
                 + b2[...])
    y = jnp.dot(h, w3[...], preferred_element_type=jnp.float32) + b3[...]
    msg = _layernorm(y, gamma[...], beta[...])
    msg_ref[...] = msg
    eupd_ref[...] = ea + msg


# ----------------------------------------------------------------------------
# Kernel 2: fused signed scatter (+msg on receivers, -msg on senders) with a
# VMEM-resident accumulator, plus the node MLP + LayerNorm + residual as an
# epilogue on the last edge tile.
# ----------------------------------------------------------------------------
def _scatter_node_kernel(recv_ref, send_ref, msg_ref, x_ref,
                         w1a, w1b, b1, w2, b2, w3, b3, gamma, beta,
                         o_ref, *, onehot_chunk):
    e = pl.program_id(1)

    @pl.when(e == 0)
    def _():
        o_ref[...] = jnp.zeros_like(o_ref)          # accumulator init

    rows_blk = o_ref.shape[0]
    te = msg_ref.shape[0]
    row_base = pl.program_id(0) * rows_blk
    recv = recv_ref[...]                            # (1, te); padded edges = -1
    send = send_ref[...]
    msg = msg_ref[...]                              # streamed from HBM once

    # Signed one-hot built in bounded (chunk, te) pieces (static loop) so the
    # VALU/VMEM cost per edge tile stays fixed even with the node axis resident.
    # TODO(synk): block-sparse edge bucketing (scalar-prefetch offsets + pl.when
    # skip) and int8 one-hot on v5e/v6e for large graphs (review items 4/5).
    for c in range(0, rows_blk, onehot_chunk):
        cur = min(onehot_chunk, rows_blk - c)
        rows = jax.lax.broadcasted_iota(jnp.int32, (cur, te), 0) + (row_base + c)
        onehot = ((rows == recv).astype(jnp.float32)
                  - (rows == send).astype(jnp.float32))
        o_ref[c:c + cur, :] += jnp.dot(onehot, msg,
                                       preferred_element_type=jnp.float32)

    # Node-MLP epilogue: x_new = LN(MLP([x, received])) + x, written in place
    # over the accumulator on the last edge tile (no HBM round trip for
    # "received", no separate node kernel launch).
    @pl.when(e == pl.num_programs(1) - 1)
    def _():
        xv = x_ref[...]
        agg = o_ref[...]
        h = jnp.tanh(
            jnp.dot(xv, w1a[...], preferred_element_type=jnp.float32)
            + jnp.dot(agg, w1b[...], preferred_element_type=jnp.float32)
            + b1[...])
        h = jnp.tanh(jnp.dot(h, w2[...], preferred_element_type=jnp.float32)
                     + b2[...])
        y = jnp.dot(h, w3[...], preferred_element_type=jnp.float32) + b3[...]
        o_ref[...] = _layernorm(y, gamma[...], beta[...]) + xv


# ----------------------------------------------------------------------------
# BlockSpec helpers
# ----------------------------------------------------------------------------
def _row_spec(tile, dim):
    # Row-tiled (tile, dim) block; feature axis kept whole (lane-dense).
    return pl.BlockSpec((tile, dim), lambda i: (i, 0))


def _const_spec(arr):
    # Full-array block, constant index_map -> stays VMEM-resident across tiles.
    return pl.BlockSpec(arr.shape, lambda *_: (0, 0))


# ----------------------------------------------------------------------------
# Forward pass (mirrors MessagePassingStep.forward)
# ----------------------------------------------------------------------------
@functools.partial(jax.jit, static_argnames=("tile_edges", "node_splits"))
def message_passing_step(params, x, senders, receivers, edge_attr,
                         tile_edges=2048, node_splits=1):
    pe, pn = params["edge"], params["node"]
    N, D = x.shape
    E = edge_attr.shape[0]

    # ---- tiling / padding ---------------------------------------------------
    te = min(tile_edges, _round_up(E, 128))      # edge tile (multiple of 128)
    e_pad = _round_up(E, te)
    n_pad = _round_up(N, 8 * node_splits)        # node axis resident per split
    rows_split = n_pad // node_splits

    x_p = jnp.pad(x, ((0, n_pad - N), (0, 0)))
    ea_p = jnp.pad(edge_attr, ((0, e_pad - E), (0, 0)))
    recv_p = jnp.pad(receivers.astype(jnp.int32), (0, e_pad - E),
                     constant_values=-1)
    send_p = jnp.pad(senders.astype(jnp.int32), (0, e_pad - E),
                     constant_values=-1)

    # Row gather stays in XLA (padded edges gather row 0, masked out of the
    # scatter by the -1 index and sliced off the outputs).
    recv_g = jnp.where(recv_p < 0, 0, recv_p)
    send_g = jnp.where(send_p < 0, 0, send_p)
    x_recv = x_p[recv_g]
    x_send = x_p[send_g]

    # ---- 1) Edge MLP (+ fused edge residual) -------------------------------
    edge_weights = (pe["w1a"], pe["w1b"], pe["w1c"], pe["b1"], pe["w2"],
                    pe["b2"], pe["w3"], pe["b3"], pe["gamma"], pe["beta"])
    wbytes_e = sum(int(w.size) * 4 for w in edge_weights)
    edge_vmem = _vmem_limit(5 * (te * D * 4) * 2 + 2 * wbytes_e)

    messages, edge_attr_update = pl.pallas_call(
        _edge_mlp_kernel,
        grid=(e_pad // te,),
        in_specs=[_row_spec(te, D), _row_spec(te, D), _row_spec(te, D)]
                 + [_const_spec(w) for w in edge_weights],
        out_specs=(_row_spec(te, D), _row_spec(te, D)),
        out_shape=(jax.ShapeDtypeStruct((e_pad, D), jnp.float32),
                   jax.ShapeDtypeStruct((e_pad, D), jnp.float32)),
        compiler_params=pltpu.CompilerParams(
            dimension_semantics=("parallel",),
            vmem_limit_bytes=edge_vmem),
    )(ea_p, x_recv, x_send, *edge_weights)

    # ---- 2) Fused signed scatter + node MLP ---------------------------------
    node_weights = (pn["w1a"], pn["w1b"], pn["b1"], pn["w2"], pn["b2"],
                    pn["w3"], pn["b3"], pn["gamma"], pn["beta"])
    wbytes_n = sum(int(w.size) * 4 for w in node_weights)
    chunk = min(rows_split, 256)
    scat_vmem = _vmem_limit(
        (te * D * 4 + 2 * te * 4) * 2          # messages + recv/send ids (dbl buf)
        + 2 * 2 * (rows_split * D * 4)         # resident x block + accumulator/out
        + 2 * wbytes_n
        + 2 * (chunk * te * 4))                # one-hot intermediate headroom

    recv2 = recv_p.reshape(1, e_pad)
    send2 = send_p.reshape(1, e_pad)
    x_update = pl.pallas_call(
        functools.partial(_scatter_node_kernel, onehot_chunk=chunk),
        grid=(node_splits, e_pad // te),
        in_specs=[pl.BlockSpec((1, te), lambda i, e: (0, e)),
                  pl.BlockSpec((1, te), lambda i, e: (0, e)),
                  pl.BlockSpec((te, D), lambda i, e: (e, 0)),
                  pl.BlockSpec((rows_split, D), lambda i, e: (i, 0))]
                 + [_const_spec(w) for w in node_weights],
        out_specs=pl.BlockSpec((rows_split, D), lambda i, e: (i, 0)),
        out_shape=jax.ShapeDtypeStruct((n_pad, D), jnp.float32),
        compiler_params=pltpu.CompilerParams(
            dimension_semantics=("parallel", "arbitrary"),
            vmem_limit_bytes=scat_vmem),
    )(recv2, send2, messages, x_p, *node_weights)

    return x_update[:N], edge_attr_update[:E]


# ----------------------------------------------------------------------------
# Parameter init (xavier-normal weights like init_weights; torch Linear-default
# uniform biases; LayerNorm affine = (1, 0)).  w1 of each MLP is stored as
# split slices so the kernels can skip the concat.
# ----------------------------------------------------------------------------
def _xavier(key, shape, fan_in, fan_out):
    std = (2.0 / (fan_in + fan_out)) ** 0.5
    return std * jax.random.normal(key, shape, jnp.float32)


def _bias(key, fan_in, dim):
    bound = 1.0 / (fan_in ** 0.5)
    return jax.random.uniform(key, (1, dim), jnp.float32, -bound, bound)


def init_message_passing_step(key, input_dim, hidden_dim, embed_dim):
    assert embed_dim == input_dim, \
        "residuals gx + x / edge_attr + messages require embed_dim == input_dim"
    d, h, e = input_dim, hidden_dim, embed_dim
    ks = jax.random.split(key, 16)
    edge = {
        "w1a": _xavier(ks[0], (d, h), 3 * d, h),   # edge_attr slice of w1
        "w1b": _xavier(ks[1], (d, h), 3 * d, h),   # x[receivers] slice of w1
        "w1c": _xavier(ks[2], (d, h), 3 * d, h),   # x[senders]  slice of w1
        "b1":  _bias(ks[3], 3 * d, h),
        "w2":  _xavier(ks[4], (h, h), h, h),
        "b2":  _bias(ks[5], h, h),
        "w3":  _xavier(ks[6], (h, e), h, e),
        "b3":  _bias(ks[7], h, e),
        "gamma": jnp.ones((1, e), jnp.float32),
        "beta":  jnp.zeros((1, e), jnp.float32),
    }
    node = {
        "w1a": _xavier(ks[8], (d, h), 2 * d, h),   # x slice of w1
        "w1b": _xavier(ks[9], (d, h), 2 * d, h),   # received-messages slice
        "b1":  _bias(ks[10], 2 * d, h),
        "w2":  _xavier(ks[11], (h, h), h, h),
        "b2":  _bias(ks[12], h, h),
        "w3":  _xavier(ks[13], (h, e), h, e),
        "b3":  _bias(ks[14], h, e),
        "gamma": jnp.ones((1, e), jnp.float32),
        "beta":  jnp.zeros((1, e), jnp.float32),
    }
    return {"edge": edge, "node": node}


# ----------------------------------------------------------------------------
# Pure-JAX reference (same math, XLA only) for a correctness check.
# ----------------------------------------------------------------------------
def _reference(params, x, senders, receivers, edge_attr):
    def mlp(inp, w1, p):
        h = jnp.tanh(inp @ w1 + p["b1"])
        h = jnp.tanh(h @ p["w2"] + p["b2"])
        y = h @ p["w3"] + p["b3"]
        mu = y.mean(-1, keepdims=True)
        var = ((y - mu) ** 2).mean(-1, keepdims=True)
        return (y - mu) / jnp.sqrt(var + _LN_EPS) * p["gamma"] + p["beta"]

    pe, pn = params["edge"], params["node"]
    w1e = jnp.concatenate([pe["w1a"], pe["w1b"], pe["w1c"]], axis=0)
    edge_in = jnp.concatenate([edge_attr, x[receivers], x[senders]], axis=1)
    msg = mlp(edge_in, w1e, pe)
    n = x.shape[0]
    r_ij = jax.ops.segment_sum(msg, receivers, n)
    r_ji = jax.ops.segment_sum(-msg, senders, n)
    w1n = jnp.concatenate([pn["w1a"], pn["w1b"]], axis=0)
    node_in = jnp.concatenate([x, r_ij + r_ji], axis=1)
    gx = mlp(node_in, w1n, pn)
    return gx + x, edge_attr + msg


# ----------------------------------------------------------------------------
# Example
# ----------------------------------------------------------------------------
if __name__ == "__main__":
    input_dim = embed_dim = 32
    hidden_dim = 32
    N = 24

    key = jax.random.PRNGKey(0)
    k_par, k_x, k_e = jax.random.split(key, 3)
    params = init_message_passing_step(k_par, input_dim, hidden_dim, embed_dim)

    # Deterministic chain graph with both edge directions (E = 2 * (N - 1)).
    recv_list, send_list = [], []
    for i in range(N - 1):
        recv_list += [i, i + 1]
        send_list += [i + 1, i]
    receivers = jnp.array(recv_list, dtype=jnp.int32)
    senders = jnp.array(send_list, dtype=jnp.int32)
    E = receivers.shape[0]

    x = jax.random.normal(k_x, (N, input_dim), jnp.float32)
    edge_attr = jax.random.normal(k_e, (E, embed_dim), jnp.float32)

    x_upd, edge_upd = message_passing_step(params, x, senders, receivers,
                                           edge_attr)
    jax.block_until_ready((x_upd, edge_upd))

    assert x_upd.shape == (N, embed_dim)
    assert edge_upd.shape == (E, embed_dim)

    x_ref, edge_ref = _reference(params, x, senders, receivers, edge_attr)
    # Tolerance allows for MXU bf16-pass precision differences between the
    # Pallas kernels and the XLA reference matmuls.
    assert bool(jnp.allclose(x_upd, x_ref, atol=1e-2, rtol=1e-2))
    assert bool(jnp.allclose(edge_upd, edge_ref, atol=1e-2, rtol=1e-2))

    print("KERNEL_OK")
</pallas_src>

<mosaic_0001>
module attributes {stable_mosaic.version = 11 : i64} {
  func.func @_edge_mlp_kernel(%arg0: i32, %arg1: memref<128x32xf32, #tpu.memory_space<vmem>>, %arg2: memref<128x32xf32, #tpu.memory_space<vmem>>, %arg3: memref<128x32xf32, #tpu.memory_space<vmem>>, %arg4: memref<32x32xf32, #tpu.memory_space<vmem>>, %arg5: memref<32x32xf32, #tpu.memory_space<vmem>>, %arg6: memref<32x32xf32, #tpu.memory_space<vmem>>, %arg7: memref<1x32xf32, #tpu.memory_space<vmem>>, %arg8: memref<32x32xf32, #tpu.memory_space<vmem>>, %arg9: memref<1x32xf32, #tpu.memory_space<vmem>>, %arg10: memref<32x32xf32, #tpu.memory_space<vmem>>, %arg11: memref<1x32xf32, #tpu.memory_space<vmem>>, %arg12: memref<1x32xf32, #tpu.memory_space<vmem>>, %arg13: memref<1x32xf32, #tpu.memory_space<vmem>>, %arg14: memref<128x32xf32, #tpu.memory_space<vmem>>, %arg15: memref<128x32xf32, #tpu.memory_space<vmem>>) attributes {dimension_semantics = [#tpu.dimension_semantics<parallel>], iteration_bounds = array<i64: 1>, scalar_prefetch = 0 : i64, scratch_operands = 0 : i64, tpu.core_type = #tpu.core_type<tc>, window_params = [{transform_indices = @transform_0, window_bounds = array<i64: 128, 32>}, {transform_indices = @transform_1, window_bounds = array<i64: 128, 32>}, {transform_indices = @transform_2, window_bounds = array<i64: 128, 32>}, {pipeline_mode = #tpu.pipeline_mode<synchronous>, transform_indices = @transform_3, window_bounds = array<i64: 32, 32>}, {pipeline_mode = #tpu.pipeline_mode<synchronous>, transform_indices = @transform_4, window_bounds = array<i64: 32, 32>}, {pipeline_mode = #tpu.pipeline_mode<synchronous>, transform_indices = @transform_5, window_bounds = array<i64: 32, 32>}, {pipeline_mode = #tpu.pipeline_mode<synchronous>, transform_indices = @transform_6, window_bounds = array<i64: 1, 32>}, {pipeline_mode = #tpu.pipeline_mode<synchronous>, transform_indices = @transform_7, window_bounds = array<i64: 32, 32>}, {pipeline_mode = #tpu.pipeline_mode<synchronous>, transform_indices = @transform_8, window_bounds = array<i64: 1, 32>}, {pipeline_mode = #tpu.pipeline_mode<synchronous>, transform_indices = @transform_9, window_bounds = array<i64: 32, 32>}, {pipeline_mode = #tpu.pipeline_mode<synchronous>, transform_indices = @transform_10, window_bounds = array<i64: 1, 32>}, {pipeline_mode = #tpu.pipeline_mode<synchronous>, transform_indices = @transform_11, window_bounds = array<i64: 1, 32>}, {pipeline_mode = #tpu.pipeline_mode<synchronous>, transform_indices = @transform_12, window_bounds = array<i64: 1, 32>}, {transform_indices = @transform_13, window_bounds = array<i64: 128, 32>}, {transform_indices = @transform_14, window_bounds = array<i64: 128, 32>}]} {
    %c0 = arith.constant 0 : index
    %c0_0 = arith.constant 0 : index
    %0 = vector.load %arg1[%c0, %c0_0] : memref<128x32xf32, #tpu.memory_space<vmem>>, vector<128x32xf32>
    %c0_1 = arith.constant 0 : index
    %c0_2 = arith.constant 0 : index
    %1 = vector.load %arg4[%c0_1, %c0_2] : memref<32x32xf32, #tpu.memory_space<vmem>>, vector<32x32xf32>
    %cst = arith.constant dense<0.000000e+00> : vector<128x32xf32>
    %2 = tpu.matmul %0, %1, %cst {dimension_numbers = #tpu.dot_dimension_numbers<[1], [0], [0], [1], [0, 0, 1, 1], [], []>} : vector<128x32xf32>, vector<32x32xf32>, vector<128x32xf32> -> vector<128x32xf32>
    %c0_3 = arith.constant 0 : index
    %c0_4 = arith.constant 0 : index
    %3 = vector.load %arg2[%c0_3, %c0_4] : memref<128x32xf32, #tpu.memory_space<vmem>>, vector<128x32xf32>
    %c0_5 = arith.constant 0 : index
    %c0_6 = arith.constant 0 : index
    %4 = vector.load %arg5[%c0_5, %c0_6] : memref<32x32xf32, #tpu.memory_space<vmem>>, vector<32x32xf32>
    %cst_7 = arith.constant dense<0.000000e+00> : vector<128x32xf32>
    %5 = tpu.matmul %3, %4, %cst_7 {dimension_numbers = #tpu.dot_dimension_numbers<[1], [0], [0], [1], [0, 0, 1, 1], [], []>} : vector<128x32xf32>, vector<32x32xf32>, vector<128x32xf32> -> vector<128x32xf32>
    %6 = arith.addf %2, %5 : vector<128x32xf32>
    %c0_8 = arith.constant 0 : index
    %c0_9 = arith.constant 0 : index
    %7 = vector.load %arg3[%c0_8, %c0_9] : memref<128x32xf32, #tpu.memory_space<vmem>>, vector<128x32xf32>
    %c0_10 = arith.constant 0 : index
    %c0_11 = arith.constant 0 : index
    %8 = vector.load %arg6[%c0_10, %c0_11] : memref<32x32xf32, #tpu.memory_space<vmem>>, vector<32x32xf32>
    %cst_12 = arith.constant dense<0.000000e+00> : vector<128x32xf32>
    %9 = tpu.matmul %7, %8, %cst_12 {dimension_numbers = #tpu.dot_dimension_numbers<[1], [0], [0], [1], [0, 0, 1, 1], [], []>} : vector<128x32xf32>, vector<32x32xf32>, vector<128x32xf32> -> vector<128x32xf32>
    %10 = arith.addf %6, %9 : vector<128x32xf32>
    %c0_13 = arith.constant 0 : index
    %c0_14 = arith.constant 0 : index
    %11 = vector.load %arg7[%c0_13, %c0_14] : memref<1x32xf32, #tpu.memory_space<vmem>>, vector<1x32xf32>
    %12 = vector.broadcast %11 : vector<1x32xf32> to vector<128x32xf32>
    %13 = arith.addf %10, %12 : vector<128x32xf32>
    %14 = math.tanh %13 : vector<128x32xf32>
    %c0_15 = arith.constant 0 : index
    %c0_16 = arith.constant 0 : index
    %15 = vector.load %arg8[%c0_15, %c0_16] : memref<32x32xf32, #tpu.memory_space<vmem>>, vector<32x32xf32>
    %cst_17 = arith.constant dense<0.000000e+00> : vector<128x32xf32>
    %16 = tpu.matmul %14, %15, %cst_17 {dimension_numbers = #tpu.dot_dimension_numbers<[1], [0], [0], [1], [0, 0, 1, 1], [], []>} : vector<128x32xf32>, vector<32x32xf32>, vector<128x32xf32> -> vector<128x32xf32>
    %c0_18 = arith.constant 0 : index
    %c0_19 = arith.constant 0 : index
    %17 = vector.load %arg9[%c0_18, %c0_19] : memref<1x32xf32, #tpu.memory_space<vmem>>, vector<1x32xf32>
    %18 = vector.broadcast %17 : vector<1x32xf32> to vector<128x32xf32>
    %19 = arith.addf %16, %18 : vector<128x32xf32>
    %20 = math.tanh %19 : vector<128x32xf32>
    %c0_20 = arith.constant 0 : index
    %c0_21 = arith.constant 0 : index
    %21 = vector.load %arg10[%c0_20, %c0_21] : memref<32x32xf32, #tpu.memory_space<vmem>>, vector<32x32xf32>
    %cst_22 = arith.constant dense<0.000000e+00> : vector<128x32xf32>
    %22 = tpu.matmul %20, %21, %cst_22 {dimension_numbers = #tpu.dot_dimension_numbers<[1], [0], [0], [1], [0, 0, 1, 1], [], []>} : vector<128x32xf32>, vector<32x32xf32>, vector<128x32xf32> -> vector<128x32xf32>
    %c0_23 = arith.constant 0 : index
    %c0_24 = arith.constant 0 : index
    %23 = vector.load %arg11[%c0_23, %c0_24] : memref<1x32xf32, #tpu.memory_space<vmem>>, vector<1x32xf32>
    %24 = vector.broadcast %23 : vector<1x32xf32> to vector<128x32xf32>
    %25 = arith.addf %22, %24 : vector<128x32xf32>
    %c0_25 = arith.constant 0 : index
    %c0_26 = arith.constant 0 : index
    %26 = vector.load %arg12[%c0_25, %c0_26] : memref<1x32xf32, #tpu.memory_space<vmem>>, vector<1x32xf32>
    %c0_27 = arith.constant 0 : index
    %c0_28 = arith.constant 0 : index
    %27 = vector.load %arg13[%c0_27, %c0_28] : memref<1x32xf32, #tpu.memory_space<vmem>>, vector<1x32xf32>
    %cst_29 = arith.constant dense<0.000000e+00> : vector<128xf32>
    %28 = vector.multi_reduction <add>, %25, %cst_29 [1] : vector<128x32xf32> to vector<128xf32>
    %29 = vector.shape_cast %28 : vector<128xf32> to vector<128x1xf32>
    %cst_30 = arith.constant 3.200000e+01 : f32
    %30 = vector.broadcast %cst_30 : f32 to vector<128x1xf32>
    %31 = arith.divf %29, %30 : vector<128x1xf32>
    %32 = vector.broadcast %31 : vector<128x1xf32> to vector<128x32xf32>
    %33 = arith.subf %25, %32 : vector<128x32xf32>
    %34 = arith.mulf %33, %33 : vector<128x32xf32>
    %cst_31 = arith.constant dense<0.000000e+00> : vector<128xf32>
    %35 = vector.multi_reduction <add>, %34, %cst_31 [1] : vector<128x32xf32> to vector<128xf32>
    %36 = vector.shape_cast %35 : vector<128xf32> to vector<128x1xf32>
    %cst_32 = arith.constant 3.200000e+01 : f32
    %37 = vector.broadcast %cst_32 : f32 to vector<128x1xf32>
    %38 = arith.divf %36, %37 : vector<128x1xf32>
    %39 = vector.broadcast %31 : vector<128x1xf32> to vector<128x32xf32>
    %40 = arith.subf %25, %39 : vector<128x32xf32>
    %cst_33 = arith.constant 9.99999974E-6 : f32
    %41 = vector.broadcast %cst_33 : f32 to vector<128x1xf32>
    %42 = arith.addf %38, %41 : vector<128x1xf32>
    %43 = math.rsqrt %42 : vector<128x1xf32>
    %44 = vector.broadcast %43 : vector<128x1xf32> to vector<128x32xf32>
    %45 = arith.mulf %40, %44 : vector<128x32xf32>
    %46 = vector.broadcast %26 : vector<1x32xf32> to vector<128x32xf32>
    %47 = arith.mulf %45, %46 : vector<128x32xf32>
    %48 = vector.broadcast %27 : vector<1x32xf32> to vector<128x32xf32>
    %49 = arith.addf %47, %48 : vector<128x32xf32>
    %c0_34 = arith.constant 0 : index
    %c0_35 = arith.constant 0 : index
    %50 = vector.load %arg14[%c0_34, %c0_35] : memref<128x32xf32, #tpu.memory_space<vmem>>, vector<128x32xf32>
    tpu.vector_store %arg14[%c0_34, %c0_35], %49 {strides = array<i32>} : memref<128x32xf32, #tpu.memory_space<vmem>>, vector<128x32xf32>,
    %51 = arith.addf %0, %49 : vector<128x32xf32>
    %c0_36 = arith.constant 0 : index
    %c0_37 = arith.constant 0 : index
    %52 = vector.load %arg15[%c0_36, %c0_37] : memref<128x32xf32, #tpu.memory_space<vmem>>, vector<128x32xf32>
    tpu.vector_store %arg15[%c0_36, %c0_37], %51 {strides = array<i32>} : memref<128x32xf32, #tpu.memory_space<vmem>>, vector<128x32xf32>,
    return
  }
  func.func @transform_0(%arg0: i32) -> (i32, i32) {
    %c0_i32 = arith.constant 0 : i32
    %c0_i32_0 = arith.constant 0 : i32
    return %arg0, %c0_i32 : i32, i32
  }
  func.func @transform_1(%arg0: i32) -> (i32, i32) {
    %c0_i32 = arith.constant 0 : i32
    %c0_i32_0 = arith.constant 0 : i32
    return %arg0, %c0_i32 : i32, i32
  }
  func.func @transform_2(%arg0: i32) -> (i32, i32) {
    %c0_i32 = arith.constant 0 : i32
    %c0_i32_0 = arith.constant 0 : i32
    return %arg0, %c0_i32 : i32, i32
  }
  func.func @transform_3(%arg0: i32) -> (i32, i32) {
    %c0_i32 = arith.constant 0 : i32
    %c0_i32_0 = arith.constant 0 : i32
    %c0_i32_1 = arith.constant 0 : i32
    return %c0_i32, %c0_i32_0 : i32, i32
  }
  func.func @transform_4(%arg0: i32) -> (i32, i32) {
    %c0_i32 = arith.constant 0 : i32
    %c0_i32_0 = arith.constant 0 : i32
    %c0_i32_1 = arith.constant 0 : i32
    return %c0_i32, %c0_i32_0 : i32, i32
  }
  func.func @transform_5(%arg0: i32) -> (i32, i32) {
    %c0_i32 = arith.constant 0 : i32
    %c0_i32_0 = arith.constant 0 : i32
    %c0_i32_1 = arith.constant 0 : i32
    return %c0_i32, %c0_i32_0 : i32, i32
  }
  func.func @transform_6(%arg0: i32) -> (i32, i32) {
    %c0_i32 = arith.constant 0 : i32
    %c0_i32_0 = arith.constant 0 : i32
    %c0_i32_1 = arith.constant 0 : i32
    return %c0_i32, %c0_i32_0 : i32, i32
  }
  func.func @transform_7(%arg0: i32) -> (i32, i32) {
    %c0_i32 = arith.constant 0 : i32
    %c0_i32_0 = arith.constant 0 : i32
    %c0_i32_1 = arith.constant 0 : i32
    return %c0_i32, %c0_i32_0 : i32, i32
  }
  func.func @transform_8(%arg0: i32) -> (i32, i32) {
    %c0_i32 = arith.constant 0 : i32
    %c0_i32_0 = arith.constant 0 : i32
    %c0_i32_1 = arith.constant 0 : i32
    return %c0_i32, %c0_i32_0 : i32, i32
  }
  func.func @transform_9(%arg0: i32) -> (i32, i32) {
    %c0_i32 = arith.constant 0 : i32
    %c0_i32_0 = arith.constant 0 : i32
    %c0_i32_1 = arith.constant 0 : i32
    return %c0_i32, %c0_i32_0 : i32, i32
  }
  func.func @transform_10(%arg0: i32) -> (i32, i32) {
    %c0_i32 = arith.constant 0 : i32
    %c0_i32_0 = arith.constant 0 : i32
    %c0_i32_1 = arith.constant 0 : i32
    return %c0_i32, %c0_i32_0 : i32, i32
  }
  func.func @transform_11(%arg0: i32) -> (i32, i32) {
    %c0_i32 = arith.constant 0 : i32
    %c0_i32_0 = arith.constant 0 : i32
    %c0_i32_1 = arith.constant 0 : i32
    return %c0_i32, %c0_i32_0 : i32, i32
  }
  func.func @transform_12(%arg0: i32) -> (i32, i32) {
    %c0_i32 = arith.constant 0 : i32
    %c0_i32_0 = arith.constant 0 : i32
    %c0_i32_1 = arith.constant 0 : i32
    return %c0_i32, %c0_i32_0 : i32, i32
  }
  func.func @transform_13(%arg0: i32) -> (i32, i32) {
    %c0_i32 = arith.constant 0 : i32
    %c0_i32_0 = arith.constant 0 : i32
    return %arg0, %c0_i32 : i32, i32
  }
  func.func @transform_14(%arg0: i32) -> (i32, i32) {
    %c0_i32 = arith.constant 0 : i32
    %c0_i32_0 = arith.constant 0 : i32
    return %arg0, %c0_i32 : i32, i32
  }
}

module attributes {stable_mosaic.version = 11 : i64} {
  func.func @_scatter_node_kernel(%arg0: i32, %arg1: i32, %arg2: memref<1x128xi32, #tpu.memory_space<vmem>>, %arg3: memref<1x128xi32, #tpu.memory_space<vmem>>, %arg4: memref<128x32xf32, #tpu.memory_space<vmem>>, %arg5: memref<24x32xf32, #tpu.memory_space<vmem>>, %arg6: memref<32x32xf32, #tpu.memory_space<vmem>>, %arg7: memref<32x32xf32, #tpu.memory_space<vmem>>, %arg8: memref<1x32xf32, #tpu.memory_space<vmem>>, %arg9: memref<32x32xf32, #tpu.memory_space<vmem>>, %arg10: memref<1x32xf32, #tpu.memory_space<vmem>>, %arg11: memref<32x32xf32, #tpu.memory_space<vmem>>, %arg12: memref<1x32xf32, #tpu.memory_space<vmem>>, %arg13: memref<1x32xf32, #tpu.memory_space<vmem>>, %arg14: memref<1x32xf32, #tpu.memory_space<vmem>>, %arg15: memref<24x32xf32, #tpu.memory_space<vmem>>) attributes {dimension_semantics = [#tpu.dimension_semantics<parallel>, #tpu.dimension_semantics<arbitrary>], iteration_bounds = array<i64: 1, 1>, scalar_prefetch = 0 : i64, scratch_operands = 0 : i64, tpu.core_type = #tpu.core_type<tc>, window_params = [{transform_indices = @transform_0, window_bounds = array<i64: 1, 128>}, {transform_indices = @transform_1, window_bounds = array<i64: 1, 128>}, {transform_indices = @transform_2, window_bounds = array<i64: 128, 32>}, {transform_indices = @transform_3, window_bounds = array<i64: 24, 32>}, {pipeline_mode = #tpu.pipeline_mode<synchronous>, transform_indices = @transform_4, window_bounds = array<i64: 32, 32>}, {pipeline_mode = #tpu.pipeline_mode<synchronous>, transform_indices = @transform_5, window_bounds = array<i64: 32, 32>}, {pipeline_mode = #tpu.pipeline_mode<synchronous>, transform_indices = @transform_6, window_bounds = array<i64: 1, 32>}, {pipeline_mode = #tpu.pipeline_mode<synchronous>, transform_indices = @transform_7, window_bounds = array<i64: 32, 32>}, {pipeline_mode = #tpu.pipeline_mode<synchronous>, transform_indices = @transform_8, window_bounds = array<i64: 1, 32>}, {pipeline_mode = #tpu.pipeline_mode<synchronous>, transform_indices = @transform_9, window_bounds = array<i64: 32, 32>}, {pipeline_mode = #tpu.pipeline_mode<synchronous>, transform_indices = @transform_10, window_bounds = array<i64: 1, 32>}, {pipeline_mode = #tpu.pipeline_mode<synchronous>, transform_indices = @transform_11, window_bounds = array<i64: 1, 32>}, {pipeline_mode = #tpu.pipeline_mode<synchronous>, transform_indices = @transform_12, window_bounds = array<i64: 1, 32>}, {transform_indices = @transform_13, window_bounds = array<i64: 24, 32>}]} {
    %c0_i32 = arith.constant 0 : i32
    %0 = arith.cmpi eq, %arg1, %c0_i32 : i32
    %1 = arith.extui %0 : i1 to i32
    %c0_i32_0 = arith.constant 0 : i32
    %2 = arith.cmpi ne, %1, %c0_i32_0 : i32
    scf.if %2 {
      %cst_13 = arith.constant 0.000000e+00 : f32
      %27 = vector.broadcast %cst_13 : f32 to vector<24x32xf32>
      %c0_14 = arith.constant 0 : index
      %c0_15 = arith.constant 0 : index
      %28 = vector.load %arg15[%c0_14, %c0_15] : memref<24x32xf32, #tpu.memory_space<vmem>>, vector<24x32xf32>
      tpu.vector_store %arg15[%c0_14, %c0_15], %27 {strides = array<i32>} : memref<24x32xf32, #tpu.memory_space<vmem>>, vector<24x32xf32>,
    } else {
    }
    %c24_i32 = arith.constant 24 : i32
    %3 = arith.muli %arg0, %c24_i32 : i32
    %c0 = arith.constant 0 : index
    %c0_1 = arith.constant 0 : index
    %4 = vector.load %arg2[%c0, %c0_1] : memref<1x128xi32, #tpu.memory_space<vmem>>, vector<1x128xi32>
    %c0_2 = arith.constant 0 : index
    %c0_3 = arith.constant 0 : index
    %5 = vector.load %arg3[%c0_2, %c0_3] : memref<1x128xi32, #tpu.memory_space<vmem>>, vector<1x128xi32>
    %c0_4 = arith.constant 0 : index
    %c0_5 = arith.constant 0 : index
    %6 = vector.load %arg4[%c0_4, %c0_5] : memref<128x32xf32, #tpu.memory_space<vmem>>, vector<128x32xf32>
    %7 = tpu.iota {dimensions = array<i32: 0>} : vector<24x128xi32>
    %c0_i32_6 = arith.constant 0 : i32
    %8 = arith.addi %3, %c0_i32_6 : i32
    %9 = vector.broadcast %8 : i32 to vector<24x128xi32>
    %10 = arith.addi %7, %9 : vector<24x128xi32>
    %11 = vector.broadcast %4 : vector<1x128xi32> to vector<24x128xi32>
    %12 = arith.cmpi eq, %10, %11 : vector<24x128xi32>
    %13 = arith.extui %12 : vector<24x128xi1> to vector<24x128xi32>
    %14 = arith.sitofp %13 : vector<24x128xi32> to vector<24x128xf32>
    %15 = vector.broadcast %5 : vector<1x128xi32> to vector<24x128xi32>
    %16 = arith.cmpi eq, %10, %15 : vector<24x128xi32>
    %17 = arith.extui %16 : vector<24x128xi1> to vector<24x128xi32>
    %18 = arith.sitofp %17 : vector<24x128xi32> to vector<24x128xf32>
    %19 = arith.subf %14, %18 : vector<24x128xf32>
    %c0_7 = arith.constant 0 : index
    %c0_8 = arith.constant 0 : index
    %20 = vector.load %arg15[%c0_7, %c0_8] : memref<24x32xf32, #tpu.memory_space<vmem>>, vector<24x32xf32>
    %cst = arith.constant dense<0.000000e+00> : vector<24x32xf32>
    %21 = tpu.matmul %19, %6, %cst {dimension_numbers = #tpu.dot_dimension_numbers<[1], [0], [0], [1], [0, 0, 1, 1], [], []>} : vector<24x128xf32>, vector<128x32xf32>, vector<24x32xf32> -> vector<24x32xf32>
    %22 = arith.addf %20, %21 : vector<24x32xf32>
    %c0_9 = arith.constant 0 : index
    %c0_10 = arith.constant 0 : index
    %23 = vector.load %arg15[%c0_9, %c0_10] : memref<24x32xf32, #tpu.memory_space<vmem>>, vector<24x32xf32>
    tpu.vector_store %arg15[%c0_9, %c0_10], %22 {strides = array<i32>} : memref<24x32xf32, #tpu.memory_space<vmem>>, vector<24x32xf32>,
    %c0_i32_11 = arith.constant 0 : i32
    %24 = arith.cmpi eq, %arg1, %c0_i32_11 : i32
    %25 = arith.extui %24 : i1 to i32
    %c0_i32_12 = arith.constant 0 : i32
    %26 = arith.cmpi ne, %25, %c0_i32_12 : i32
    scf.if %26 {
      %c0_13 = arith.constant 0 : index
      %c0_14 = arith.constant 0 : index
      %27 = vector.load %arg5[%c0_13, %c0_14] : memref<24x32xf32, #tpu.memory_space<vmem>>, vector<24x32xf32>
      %c0_15 = arith.constant 0 : index
      %c0_16 = arith.constant 0 : index
      %28 = vector.load %arg15[%c0_15, %c0_16] : memref<24x32xf32, #tpu.memory_space<vmem>>, vector<24x32xf32>
      %c0_17 = arith.constant 0 : index
      %c0_18 = arith.constant 0 : index
      %29 = vector.load %arg6[%c0_17, %c0_18] : memref<32x32xf32, #tpu.memory_space<vmem>>, vector<32x32xf32>
      %cst_19 = arith.constant dense<0.000000e+00> : vector<24x32xf32>
      %30 = tpu.matmul %27, %29, %cst_19 {dimension_numbers = #tpu.dot_dimension_numbers<[1], [0], [0], [1], [0, 0, 1, 1], [], []>} : vector<24x32xf32>, vector<32x32xf32>, vector<24x32xf32> -> vector<24x32xf32>
      %c0_20 = arith.constant 0 : index
      %c0_21 = arith.constant 0 : index
      %31 = vector.load %arg7[%c0_20, %c0_21] : memref<32x32xf32, #tpu.memory_space<vmem>>, vector<32x32xf32>
      %cst_22 = arith.constant dense<0.000000e+00> : vector<24x32xf32>
      %32 = tpu.matmul %28, %31, %cst_22 {dimension_numbers = #tpu.dot_dimension_numbers<[1], [0], [0], [1], [0, 0, 1, 1], [], []>} : vector<24x32xf32>, vector<32x32xf32>, vector<24x32xf32> -> vector<24x32xf32>
      %33 = arith.addf %30, %32 : vector<24x32xf32>
      %c0_23 = arith.constant 0 : index
      %c0_24 = arith.constant 0 : index
      %34 = vector.load %arg8[%c0_23, %c0_24] : memref<1x32xf32, #tpu.memory_space<vmem>>, vector<1x32xf32>
      %35 = vector.broadcast %34 : vector<1x32xf32> to vector<24x32xf32>
      %36 = arith.addf %33, %35 : vector<24x32xf32>
      %37 = math.tanh %36 : vector<24x32xf32>
      %c0_25 = arith.constant 0 : index
      %c0_26 = arith.constant 0 : index
      %38 = vector.load %arg9[%c0_25, %c0_26] : memref<32x32xf32, #tpu.memory_space<vmem>>, vector<32x32xf32>
      %cst_27 = arith.constant dense<0.000000e+00> : vector<24x32xf32>
      %39 = tpu.matmul %37, %38, %cst_27 {dimension_numbers = #tpu.dot_dimension_numbers<[1], [0], [0], [1], [0, 0, 1, 1], [], []>} : vector<24x32xf32>, vector<32x32xf32>, vector<24x32xf32> -> vector<24x32xf32>
      %c0_28 = arith.constant 0 : index
      %c0_29 = arith.constant 0 : index
      %40 = vector.load %arg10[%c0_28, %c0_29] : memref<1x32xf32, #tpu.memory_space<vmem>>, vector<1x32xf32>
      %41 = vector.broadcast %40 : vector<1x32xf32> to vector<24x32xf32>
      %42 = arith.addf %39, %41 : vector<24x32xf32>
      %43 = math.tanh %42 : vector<24x32xf32>
      %c0_30 = arith.constant 0 : index
      %c0_31 = arith.constant 0 : index
      %44 = vector.load %arg11[%c0_30, %c0_31] : memref<32x32xf32, #tpu.memory_space<vmem>>, vector<32x32xf32>
      %cst_32 = arith.constant dense<0.000000e+00> : vector<24x32xf32>
      %45 = tpu.matmul %43, %44, %cst_32 {dimension_numbers = #tpu.dot_dimension_numbers<[1], [0], [0], [1], [0, 0, 1, 1], [], []>} : vector<24x32xf32>, vector<32x32xf32>, vector<24x32xf32> -> vector<24x32xf32>
      %c0_33 = arith.constant 0 : index
      %c0_34 = arith.constant 0 : index
      %46 = vector.load %arg12[%c0_33, %c0_34] : memref<1x32xf32, #tpu.memory_space<vmem>>, vector<1x32xf32>
      %47 = vector.broadcast %46 : vector<1x32xf32> to vector<24x32xf32>
      %48 = arith.addf %45, %47 : vector<24x32xf32>
      %c0_35 = arith.constant 0 : index
      %c0_36 = arith.constant 0 : index
      %49 = vector.load %arg13[%c0_35, %c0_36] : memref<1x32xf32, #tpu.memory_space<vmem>>, vector<1x32xf32>
      %c0_37 = arith.constant 0 : index
      %c0_38 = arith.constant 0 : index
      %50 = vector.load %arg14[%c0_37, %c0_38] : memref<1x32xf32, #tpu.memory_space<vmem>>, vector<1x32xf32>
      %cst_39 = arith.constant dense<0.000000e+00> : vector<24xf32>
      %51 = vector.multi_reduction <add>, %48, %cst_39 [1] : vector<24x32xf32> to vector<24xf32>
      %52 = vector.shape_cast %51 : vector<24xf32> to vector<24x1xf32>
      %cst_40 = arith.constant 3.200000e+01 : f32
      %53 = vector.broadcast %cst_40 : f32 to vector<24x1xf32>
      %54 = arith.divf %52, %53 : vector<24x1xf32>
      %55 = vector.broadcast %54 : vector<24x1xf32> to vector<24x32xf32>
      %56 = arith.subf %48, %55 : vector<24x32xf32>
      %57 = arith.mulf %56, %56 : vector<24x32xf32>
      %cst_41 = arith.constant dense<0.000000e+00> : vector<24xf32>
      %58 = vector.multi_reduction <add>, %57, %cst_41 [1] : vector<24x32xf32> to vector<24xf32>
      %59 = vector.shape_cast %58 : vector<24xf32> to vector<24x1xf32>
      %cst_42 = arith.constant 3.200000e+01 : f32
      %60 = vector.broadcast %cst_42 : f32 to vector<24x1xf32>
      %61 = arith.divf %59, %60 : vector<24x1xf32>
      %62 = vector.broadcast %54 : vector<24x1xf32> to vector<24x32xf32>
      %63 = arith.subf %48, %62 : vector<24x32xf32>
      %cst_43 = arith.constant 9.99999974E-6 : f32
      %64 = vector.broadcast %cst_43 : f32 to vector<24x1xf32>
      %65 = arith.addf %61, %64 : vector<24x1xf32>
      %66 = math.rsqrt %65 : vector<24x1xf32>
      %67 = vector.broadcast %66 : vector<24x1xf32> to vector<24x32xf32>
      %68 = arith.mulf %63, %67 : vector<24x32xf32>
      %69 = vector.broadcast %49 : vector<1x32xf32> to vector<24x32xf32>
      %70 = arith.mulf %68, %69 : vector<24x32xf32>
      %71 = vector.broadcast %50 : vector<1x32xf32> to vector<24x32xf32>
      %72 = arith.addf %70, %71 : vector<24x32xf32>
      %73 = arith.addf %72, %27 : vector<24x32xf32>
      %c0_44 = arith.constant 0 : index
      %c0_45 = arith.constant 0 : index
      %74 = vector.load %arg15[%c0_44, %c0_45] : memref<24x32xf32, #tpu.memory_space<vmem>>, vector<24x32xf32>
      tpu.vector_store %arg15[%c0_44, %c0_45], %73 {strides = array<i32>} : memref<24x32xf32, #tpu.memory_space<vmem>>, vector<24x32xf32>,
    } else {
    }
    return
  }
  func.func @transform_0(%arg0: i32, %arg1: i32) -> (i32, i32) {
    %c0_i32 = arith.constant 0 : i32
    %c0_i32_0 = arith.constant 0 : i32
    return %c0_i32, %arg1 : i32, i32
  }
  func.func @transform_1(%arg0: i32, %arg1: i32) -> (i32, i32) {
    %c0_i32 = arith.constant 0 : i32
    %c0_i32_0 = arith.constant 0 : i32
    return %c0_i32, %arg1 : i32, i32
  }
  func.func @transform_2(%arg0: i32, %arg1: i32) -> (i32, i32) {
    %c0_i32 = arith.constant 0 : i32
    %c0_i32_0 = arith.constant 0 : i32
    return %arg1, %c0_i32 : i32, i32
  }
  func.func @transform_3(%arg0: i32, %arg1: i32) -> (i32, i32) {
    %c0_i32 = arith.constant 0 : i32
    %c0_i32_0 = arith.constant 0 : i32
    return %arg0, %c0_i32 : i32, i32
  }
  func.func @transform_4(%arg0: i32, %arg1: i32) -> (i32, i32) {
    %c0_i32 = arith.constant 0 : i32
    %c0_i32_0 = arith.constant 0 : i32
    %c0_i32_1 = arith.constant 0 : i32
    return %c0_i32, %c0_i32_0 : i32, i32
  }
  func.func @transform_5(%arg0: i32, %arg1: i32) -> (i32, i32) {
    %c0_i32 = arith.constant 0 : i32
    %c0_i32_0 = arith.constant 0 : i32
    %c0_i32_1 = arith.constant 0 : i32
    return %c0_i32, %c0_i32_0 : i32, i32
  }
  func.func @transform_6(%arg0: i32, %arg1: i32) -> (i32, i32) {
    %c0_i32 = arith.constant 0 : i32
    %c0_i32_0 = arith.constant 0 : i32
    %c0_i32_1 = arith.constant 0 : i32
    return %c0_i32, %c0_i32_0 : i32, i32
  }
  func.func @transform_7(%arg0: i32, %arg1: i32) -> (i32, i32) {
    %c0_i32 = arith.constant 0 : i32
    %c0_i32_0 = arith.constant 0 : i32
    %c0_i32_1 = arith.constant 0 : i32
    return %c0_i32, %c0_i32_0 : i32, i32
  }
  func.func @transform_8(%arg0: i32, %arg1: i32) -> (i32, i32) {
    %c0_i32 = arith.constant 0 : i32
    %c0_i32_0 = arith.constant 0 : i32
    %c0_i32_1 = arith.constant 0 : i32
    return %c0_i32, %c0_i32_0 : i32, i32
  }
  func.func @transform_9(%arg0: i32, %arg1: i32) -> (i32, i32) {
    %c0_i32 = arith.constant 0 : i32
    %c0_i32_0 = arith.constant 0 : i32
    %c0_i32_1 = arith.constant 0 : i32
    return %c0_i32, %c0_i32_0 : i32, i32
  }
  func.func @transform_10(%arg0: i32, %arg1: i32) -> (i32, i32) {
    %c0_i32 = arith.constant 0 : i32
    %c0_i32_0 = arith.constant 0 : i32
    %c0_i32_1 = arith.constant 0 : i32
    return %c0_i32, %c0_i32_0 : i32, i32
  }
  func.func @transform_11(%arg0: i32, %arg1: i32) -> (i32, i32) {
    %c0_i32 = arith.constant 0 : i32
    %c0_i32_0 = arith.constant 0 : i32
    %c0_i32_1 = arith.constant 0 : i32
    return %c0_i32, %c0_i32_0 : i32, i32
  }
  func.func @transform_12(%arg0: i32, %arg1: i32) -> (i32, i32) {
    %c0_i32 = arith.constant 0 : i32
    %c0_i32_0 = arith.constant 0 : i32
    %c0_i32_1 = arith.constant 0 : i32
    return %c0_i32, %c0_i32_0 : i32, i32
  }
  func.func @transform_13(%arg0: i32, %arg1: i32) -> (i32, i32) {
    %c0_i32 = arith.constant 0 : i32
    %c0_i32_0 = arith.constant 0 : i32
    return %arg0, %c0_i32 : i32, i32
  }
}

</mosaic_0001>

<bundles_post_ra>
// kernel: message_passing_step.3
= control target key start
LH: loop header
LB: loop body
LE: loop exit
PB: predicated region body
PF: predicated region fallthrough
CT: control target
= control target key end

     0   :  { %vm49_vm0 = vcmask 261120   ;;  %v926_v1 = vmov 0.0   ;;  %vm927_vm1 = vmmov 0   ;;  %s1244_s0 = inlined_call_operand.vmem [shape: s32[1,128], index: 0, kind: input, shape index: {}]   ;;  %s1245_s1 = inlined_call_operand.vmem [shape: s32[1,128], index: 1, kind: input, shape index: {}]   ;;  %s1246_s2 = inlined_call_operand.vmem [shape: f32[128,32], index: 2, kind: input, shape index: {}]   ;;  %s1247_s3 = inlined_call_operand.vmem [shape: f32[24,32], index: 3, kind: input, shape index: {}]   ;;  %s1248_s4 = inlined_call_operand.vmem [shape: f32[32,32], index: 4, kind: input, shape index: {}]   ;;  %s1249_s5 = inlined_call_operand.vmem [shape: f32[32,32], index: 5, kind: input, shape index: {}]   ;;  %s1250_s6 = inlined_call_operand.vmem [shape: f32[1,32], index: 6, kind: input, shape index: {}]   ;;  %s1251_s7 = inlined_call_operand.vmem [shape: f32[32,32], index: 7, kind: input, shape index: {}]   ;;  %s1252_s8 = inlined_call_operand.vmem [shape: f32[1,32], index: 8, kind: input, shape index: {}]   ;;  %s1253_s9 = inlined_call_operand.vmem [shape: f32[32,32], index: 9, kind: input, shape index: {}]   ;;  %s1254_s10 = inlined_call_operand.vmem [shape: f32[1,32], index: 10, kind: input, shape index: {}]   ;;  %s1255_s11 = inlined_call_operand.vmem [shape: f32[1,32], index: 11, kind: input, shape index: {}]   ;;  %s1256_s12 = inlined_call_operand.vmem [shape: f32[1,32], index: 12, kind: input, shape index: {}]   ;;  %s1257_s13 = inlined_call_operand.hbm [shape: f32[24,32], index: 13, kind: output, shape index: {}]  }
   0x1   :  { %v71_v0 = vld [vmem:[%s1246_s2 + $0x78] sm:$0xff]  ;;  %764 = vmatprep.subr.mxu0 %v926_v1  ;;  %v70_v2 = vld [vmem:[%s1246_s2 + $0x70] sm:$0xff]  ;;  %796 = vmatprep.mubr.msk.f32.mxu0 %vm927_vm1, %v926_v1  ;;  %50 = vst.msk [vmem:[#allocation2] sm:$0xff] %vm49_vm0, %v926_v1  ;;  %51 = vst.msk [vmem:[#allocation2 + $0x8] sm:$0xff] %vm49_vm0, %v926_v1 }
   0x2   :  { %52 = vst.msk [vmem:[#allocation2 + $0x10] sm:$0xff] %vm49_vm0, %v926_v1  ;;  %765 = vmatpush3.msra.mxu0 %v71_v0  ;;  %805 = vmatprep.subr.mxu1 %v926_v1  ;;  %v69_v3 = vld [vmem:[%s1246_s2 + $0x68] sm:$0xff]  ;;  %v68_v4 = vld [vmem:[%s1246_s2 + $0x60] sm:$0xff] }
   0x3   :  { %766 = vmatprep.subr.mxu0 %v926_v1  ;;  %813 = vmatprep.mubr.msk.f32.mxu1 %vm927_vm1, %v926_v1 }
   0x4   :  { %767 = vmatpush3.msra.mxu0 %v70_v2 }
   0x5   :  { %768 = vmatprep.subr.mxu0 %v926_v1 }
   0x6   :  { %769 = vmatpush3.msra.mxu0 %v69_v3 }
   0x7   :  { %18 = vsyncpa [#allocation3], 0  ;;  %770 = vmatprep.subr.mxu0 %v926_v1  ;;  %v67_v5 = vld [vmem:[%s1246_s2 + $0x58] sm:$0xff]  ;;  %v66_v6 = vld [vmem:[%s1246_s2 + $0x50] sm:$0xff]  ;;  %v72_v10 = vlaneseq }
   0x8   :  { %771 = vmatpush3.msra.mxu0 %v68_v4  ;;  %v65_v7 = vld [vmem:[%s1246_s2 + $0x48] sm:$0xff]  ;;  %v64_v8 = vld [vmem:[%s1246_s2 + $0x40] sm:$0xff]  ;;  %v63_v9 = vld [vmem:[%s1246_s2 + $0x38] sm:$0xff] }
   0x9   :  { %772 = vmatprep.subr.mxu0 %v926_v1  ;;  %v62_v11 = vld [vmem:[%s1246_s2 + $0x30] sm:$0xff]  ;;  %v61_v12 = vld [vmem:[%s1246_s2 + $0x28] sm:$0xff]  ;;  %v73_v13 = vshrl.u32 %v72_v10, 7  ;;  %v692_v14 = vld [vmem:[%s1244_s0] ss:$0 sm:$0xff] }
   0xa   :  { %773 = vmatpush3.msra.mxu0 %v67_v5  ;;  %v696_v15 = vld [vmem:[%s1245_s1] ss:$0 sm:$0xff]  ;;  %v59_v17 = vld [vmem:[%s1246_s2 + $0x18] sm:$0xff]  ;;  %v58_v19 = vld [vmem:[%s1246_s2 + $0x10] sm:$0xff] }
   0xb   :  { %774 = vmatprep.subr.mxu0 %v926_v1  ;;  %v60_v16 = vld [vmem:[%s1246_s2 + $0x20] sm:$0xff]  ;;  %vm84_vm2 = vcmp.eq.s32.totalorder %v73_v13, %v692_v14  ;;  %vm97_vm3 = vcmp.eq.s32.totalorder %v73_v13, %v696_v15  ;;  %v74_v18 = vadd.s32 8, %v73_v13  ;;  %v57_v22 = vld [vmem:[%s1246_s2 + $0x8] sm:$0xff]  ;;  %v75_v23 = vadd.s32 16, %v73_v13  ;;  %v215_v32 = vld [vmem:[%s1249_s5 + $0x18] sm:$0xff] }
   0xc   :  { %775 = vmatpush3.msra.mxu0 %v66_v6  ;;  %v693_v20 = vsel %vm84_vm2, 1.0, %v926_v1  ;;  %v697_v21 = vsel %vm97_vm3, 1.0, %v926_v1  ;;  %v56_v24 = vld [vmem:[%s1246_s2] sm:$0xff]  ;;  %806 = vmatpush3.msra.mxu1 %v215_v32  ;;  %v214_v33 = vld [vmem:[%s1249_s5 + $0x10] sm:$0xff]  ;;  %v213_v34 = vld [vmem:[%s1249_s5 + $0x8] sm:$0xff] }
   0xd   :  { %776 = vmatprep.subr.mxu0 %v926_v1  ;;  %vm85_vm4 = vcmp.eq.s32.totalorder %v74_v18, %v692_v14  ;;  %vm98_vm5 = vcmp.eq.s32.totalorder %v74_v18, %v696_v15  ;;  %v106_v25 = vsub.f32 %v693_v20, %v697_v21  ;;  %vm86_vm6 = vcmp.eq.s32.totalorder %v75_v23, %v692_v14  ;;  %v212_v35 = vld [vmem:[%s1249_s5] sm:$0xff]  ;;  %v110_v40 = vld [vmem:[#allocation2 + $0x8] sm:$0xff]  ;;  %v111_v44 = vld [vmem:[#allocation2 + $0x10] sm:$0xff] }
   0xe   :  { %777 = vmatpush3.msra.mxu0 %v65_v7  ;;  %v694_v26 = vsel %vm85_vm4, 1.0, %v926_v1  ;;  %v698_v27 = vsel %vm98_vm5, 1.0, %v926_v1  ;;  %vm99_vm7 = vcmp.eq.s32.totalorder %v75_v23, %v696_v15  ;;  %v695_v29 = vsel %vm86_vm6, 1.0, %v926_v1  ;;  %807 = vmatprep.subr.mxu1 %v926_v1  ;;  %v109_v36 = vld [vmem:[#allocation2] sm:$0xff]  ;;  %v211_v47 = vld [vmem:[%s1248_s4 + $0x18] sm:$0xff]  ;;  %v210_v50 = vld [vmem:[%s1248_s4 + $0x10] sm:$0xff] }
   0xf   :  { %778 = vmatprep.subr.mxu0 %v926_v1  ;;  %v107_v28 = vsub.f32 %v694_v26, %v698_v27  ;;  %v699_v30 = vsel %vm99_vm7, 1.0, %v926_v1  ;;  %808 = vmatpush3.msra.mxu1 %v214_v33  ;;  %v209_v51 = vld [vmem:[%s1248_s4 + $0x8] sm:$0xff]  ;;  %v208_v53 = vld [vmem:[%s1248_s4] sm:$0xff]  ;;  %v1160_v57 = vld [vmem:[%s1247_s3 + $0x10] sm:$0xff] }
  0x10   :  { %779 = vmatpush3.msra.mxu0 %v64_v8  ;;  %v108_v31 = vsub.f32 %v695_v29, %v699_v30  ;;  %809 = vmatprep.subr.mxu1 %v926_v1  ;;  %v1142_v55 = vld [vmem:[%s1247_s3] sm:$0xff]  ;;  %v1151_v56 = vld [vmem:[%s1247_s3 + $0x8] sm:$0xff]  ;;  %v410_v58 = vld [vmem:[%s1251_s7 + $0x18] sm:$0xff] }
  0x11   :  { %780 = vmatprep.subr.mxu0 %v926_v1  ;;  %810 = vmatpush3.msra.mxu1 %v213_v34  ;;  %v409_v59 = vld [vmem:[%s1251_s7 + $0x10] sm:$0xff]  ;;  %v408_v60 = vld [vmem:[%s1251_s7 + $0x8] sm:$0xff]  ;;  %v407_v61 = vld [vmem:[%s1251_s7] sm:$0xff] }
  0x12   :  { %781 = vmatpush3.msra.mxu0 %v63_v9  ;;  %811 = vmatprep.subr.mxu1 %v926_v1  ;;  %v706_v6 = vld [vmem:[%s1250_s6] ss:$0 sm:$0xff]  ;;  %v513_v21 = vld [vmem:[%s1253_s9 + $0x18] sm:$0xff]  ;;  %v511_v23 = vld [vmem:[%s1253_s9 + $0x8] sm:$0xff] }
  0x13   :  { %782 = vmatprep.subr.mxu0 %v926_v1  ;;  %812 = vmatpush3.msra.mxu1 %v212_v35 }
  0x14   :  { %783 = vmatpush3.msra.mxu0 %v62_v11  ;;  %822 = vmatprep.subr.mxu1 %v926_v1 }
  0x15   :  { %784 = vmatprep.subr.mxu0 %v926_v1 }
  0x16   :  { %785 = vmatpush3.msra.mxu0 %v61_v12 }
  0x17   :  { %786 = vmatprep.subr.mxu0 %v926_v1 }
  0x18   :  { %787 = vmatpush3.msra.mxu0 %v60_v16 }
  0x19   :  { %788 = vmatprep.subr.mxu0 %v926_v1 }
  0x1a   :  { %789 = vmatpush3.msra.mxu0 %v59_v17 }
  0x1b   :  { %790 = vmatprep.subr.mxu0 %v926_v1 }
  0x1c   :  { %791 = vmatpush3.msra.mxu0 %v58_v19 }
  0x1d   :  { %792 = vmatprep.subr.mxu0 %v926_v1 }
  0x1e   :  { %793 = vmatpush3.msra.mxu0 %v57_v22  ;;  %v512_v22 = vld [vmem:[%s1253_s9 + $0x10] sm:$0xff] }
  0x1f   :  { %794 = vmatprep.subr.mxu0 %v926_v1 }
  0x20   :  { %795 = vmatpush3.msra.mxu0 %v56_v24  ;;  %v510_v24 = vld [vmem:[%s1253_s9] sm:$0xff] }
  0x21   :  { %797 = vmatmul.mubr.f32.vlgmr.msra.gmra.mxu0 %v106_v25  ;;  %856 = vmatprep.subr.mxu0 %v926_v1  ;;  %v707_v25 = vld [vmem:[%s1252_s8] ss:$0 sm:$0xff] }
  0x22   :  { %799 = vmatprep.mubr.msk.f32.mxu0 %vm927_vm1, %v926_v1  ;;  %857 = vmatpush3.msra.mxu0 %v513_v21 }
  0x23   :  { %858 = vmatprep.subr.mxu0 %v926_v1 }
  0x24   :  { %859 = vmatpush3.msra.mxu0 %v512_v22 }
  0x25   :  { %800 = vmatmul.mubr.f32.gmra.mxu0 %v107_v28  ;;  %860 = vmatprep.subr.mxu0 %v926_v1 }
  0x26   :  { %802 = vmatprep.mubr.msk.f32.mxu0 %vm927_vm1, %v926_v1  ;;  %861 = vmatpush3.msra.mxu0 %v511_v23 }
  0x27   :  { %862 = vmatprep.subr.mxu0 %v926_v1 }
  0x28   :  { %863 = vmatpush3.msra.mxu0 %v510_v24 }
  0x29   :  { %803 = vmatmul.mubr.f32.gmra.mxu0 %v108_v31 }
  0x2a   :  { %864 = vmatprep.mubr.msk.f32.mxu0 %vm927_vm1, %v926_v1 }
  0xe1   :  { %v178_v37 = vpop.f32.mrf.mxu0 }
  0xe2   :  { %v192_v38 = vadd.f32 %v178_v37, %v109_v36 }
  0xe3   :  { %v798_v39 = vpop.f32.mrf.mxu0 }
  0xe4   :  { %196 = vst.msk [vmem:[#allocation2] sm:$0xff] %vm49_vm0, %v192_v38  ;;  %v711_v38 = vld [vmem:[%s1254_s10] ss:$0 sm:$0xff] }
  0xe5   :  { %v183_v41 = vpop.f32.mrf.mxu0 }
  0xe6   :  { %v193_v42 = vadd.f32 %v183_v41, %v110_v40 }
  0xe7   :  { %v801_v43 = vpop.f32.mrf.mxu0 }
  0xe8   :  { %197 = vst.msk [vmem:[#allocation2 + $0x8] sm:$0xff] %vm49_vm0, %v193_v42 }
  0xe9   :  { %v188_v45 = vpop.f32.mrf.mxu0 }
  0xea   :  { %v194_v46 = vadd.f32 %v188_v45, %v111_v44 }
  0xeb   :  { %v804_v48 = vpop.f32.mrf.mxu0  ;;  %v205_v49 = vld [vmem:[#allocation2] sm:$0xff] }
  0xec   :  { %198 = vst.msk [vmem:[#allocation2 + $0x10] sm:$0xff] %vm49_vm0, %v194_v46  ;;  %814 = vmatmul.mubr.msk.f32.vlgmr.msra.gmra.mxu1 %vm49_vm0, %v205_v49 }
  0xed   :  { %823 = vmatpush3.msra.mxu1 %v211_v47  ;;  %816 = vmatprep.mubr.msk.f32.mxu1 %vm927_vm1, %v926_v1 }
  0xee   :  { %824 = vmatprep.subr.mxu1 %v926_v1 }
  0xef   :  { %825 = vmatpush3.msra.mxu1 %v210_v50  ;;  %v206_v52 = vld [vmem:[#allocation2 + $0x8] sm:$0xff] }
  0xf0   :  { %817 = vmatmul.mubr.msk.f32.gmra.mxu1 %vm49_vm0, %v206_v52  ;;  %826 = vmatprep.subr.mxu1 %v926_v1 }
  0xf1   :  { %827 = vmatpush3.msra.mxu1 %v209_v51  ;;  %819 = vmatprep.mubr.msk.f32.mxu1 %vm927_vm1, %v926_v1 }
  0xf2   :  { %828 = vmatprep.subr.mxu1 %v926_v1 }
  0xf3   :  { %v207_v54 = vld [vmem:[#allocation2 + $0x10] sm:$0xff]  ;;  %829 = vmatpush3.msra.mxu1 %v208_v53 }
  0xf4   :  { %820 = vmatmul.mubr.msk.f32.gmra.mxu1 %vm49_vm0, %v207_v54  ;;  %839 = vmatprep.subr.mxu1 %v926_v1 }
  0xf5   :  { %830 = vmatprep.mubr.msk.f32.mxu1 %vm927_vm1, %v926_v1 }
  0xf8   :  { %831 = vmatmul.mubr.msk.f32.vlgmr.msra.gmra.mxu1 %vm49_vm0, %v1142_v55 }
  0xf9   :  { %833 = vmatprep.mubr.msk.f32.mxu1 %vm927_vm1, %v926_v1  ;;  %840 = vmatpush3.msra.mxu1 %v410_v58 }
  0xfa   :  { %841 = vmatprep.subr.mxu1 %v926_v1 }
  0xfb   :  { %842 = vmatpush3.msra.mxu1 %v409_v59 }
  0xfc   :  { %834 = vmatmul.mubr.msk.f32.gmra.mxu1 %vm49_vm0, %v1151_v56  ;;  %843 = vmatprep.subr.mxu1 %v926_v1 }
  0xfd   :  { %836 = vmatprep.mubr.msk.f32.mxu1 %vm927_vm1, %v926_v1  ;;  %844 = vmatpush3.msra.mxu1 %v408_v60 }
  0xfe   :  { %845 = vmatprep.subr.mxu1 %v926_v1 }
  0xff   :  { %846 = vmatpush3.msra.mxu1 %v407_v61 }
 0x100   :  { %837 = vmatmul.mubr.msk.f32.gmra.mxu1 %vm49_vm0, %v1160_v57  ;;  %873 = vmatprep.subr.mxu1 %v926_v1 }
 0x101   :  { %847 = vmatprep.mubr.msk.f32.mxu1 %vm927_vm1, %v926_v1 }
 0x1ac   :  { %v291_v62 = vpop.f32.mrf.mxu1 }
 0x1ae   :  { %v815_v63 = vpop.f32.mrf.mxu1 }
 0x1b0   :  { %v296_v0 = vpop.f32.mrf.mxu1 }
 0x1b2   :  { %v818_v2 = vpop.f32.mrf.mxu1 }
 0x1b4   :  { %v301_v3 = vpop.f32.mrf.mxu1 }
 0x1b6   :  { %v821_v4 = vpop.f32.mrf.mxu1 }
 0x1b8   :  { %v380_v5 = vpop.f32.mrf.mxu1 }
 0x1b9   :  { %v381_v7 = vadd.f32 %v380_v5, %v291_v62 }
 0x1ba   :  { %v832_v8 = vpop.f32.mrf.mxu1 }
 0x1bb   :  { %v401_v9 = vadd.f32 %v706_v6, %v381_v7 }
 0x1bc   :  { %v385_v10 = vpop.f32.mrf.mxu1 }
 0x1bd   :  { %886 = vtanh.f32 %v401_v9  ;;  %v386_v11 = vadd.f32 %v385_v10, %v296_v0 }
 0x1be   :  { %v835_v12 = vpop.f32.mrf.mxu1 }
 0x1bf   :  { %v402_v13 = vadd.f32 %v706_v6, %v386_v11 }
 0x1c0   :  { %v390_v14 = vpop.f32.mrf.mxu1 }
 0x1c1   :  { %888 = vtanh.f32 %v402_v13  ;;  %v391_v15 = vadd.f32 %v390_v14, %v301_v3 }
 0x1c2   :  { %v838_v16 = vpop.f32.mrf.mxu1 }
 0x1c3   :  { %v403_v17 = vadd.f32 %v706_v6, %v391_v15  ;;  %v715_v15 = vld [vmem:[%s1255_s11] ss:$0 sm:$0xff]  ;;  %s928_s11 = smov [#allocation2]  }
 0x1c4   :  { %s681_s23 = sshll.u32 %s928_s11, 4  ;;  %s682_s23 = int_to_ptr.vmem [resolvable:$true] %s681_s23 }
 0x1c5   :  { %890 = vtanh.f32 %v403_v17  ;;  %v716_v17 = vld [vmem:[%s1256_s12] ss:$0 sm:$0xff]  ;;  %s904_s12 = scalar_lea.vmem %s682_s23, 384  ;;  %p909_p1 = scmp.lt.s32.totalorder %s682_s23, %s682_s23 }
 0x1c6   :  { %p905_p0 = scmp.ne.s32.totalorder %s682_s23, %s904_s12  ;;  %p910_p2 = scmp.lt.s32.totalorder %s904_s12, %s904_s12 }
 0x1c8   :  { %p911_p3 = por %p910_p2, %p909_p1 }
 0x1ca   :  { %v887_v18 = vpop.eup %886  ;;  %p912_p4 = pnand %p911_p3, %p905_p0 }
 0x1cb   :  { %848 = vmatmul.mubr.msk.f32.vlgmr.msra.gmra.mxu1 %vm49_vm0, %v887_v18 }
 0x1cc   :  { %850 = vmatprep.mubr.msk.f32.mxu1 %vm927_vm1, %v926_v1  ;;  %877 = vmatpush3.msra.mxu1 %v513_v21 }
 0x1cd   :  { %874 = vmatprep.subr.mxu1 %v926_v1 }
 0x1ce   :  { %v889_v19 = vpop.eup %888  ;;  %878 = vmatpush3.msra.mxu1 %v512_v22 }
 0x1cf   :  { %851 = vmatmul.mubr.msk.f32.gmra.mxu1 %vm49_vm0, %v889_v19  ;;  %875 = vmatprep.subr.mxu1 %v926_v1 }
 0x1d0   :  { %853 = vmatprep.mubr.msk.f32.mxu1 %vm927_vm1, %v926_v1  ;;  %879 = vmatpush3.msra.mxu1 %v511_v23 }
 0x1d1   :  { %876 = vmatprep.subr.mxu1 %v926_v1 }
 0x1d2   :  { %v891_v20 = vpop.eup %890  ;;  %880 = vmatpush3.msra.mxu1 %v510_v24 }
 0x1d3   :  { %854 = vmatmul.mubr.msk.f32.gmra.mxu1 %vm49_vm0, %v891_v20 }
 0x1d4   :  { %867 = vmatprep.mubr.msk.f32.mxu1 %vm927_vm1, %v926_v1 }
 0x28b   :  { %v493_v26 = vpop.f32.mrf.mxu1 }
 0x28c   :  { %v494_v27 = vadd.f32 %v707_v25, %v493_v26 }
 0x28d   :  { %v849_v28 = vpop.f32.mrf.mxu1 }
 0x28e   :  { %892 = vtanh.f32 %v494_v27 }
 0x28f   :  { %v498_v29 = vpop.f32.mrf.mxu1 }
 0x290   :  { %v499_v30 = vadd.f32 %v707_v25, %v498_v29 }
 0x291   :  { %v852_v31 = vpop.f32.mrf.mxu1 }
 0x292   :  { %894 = vtanh.f32 %v499_v30 }
 0x293   :  { %v503_v32 = vpop.f32.mrf.mxu1 }
 0x294   :  { %v504_v33 = vadd.f32 %v707_v25, %v503_v32 }
 0x295   :  { %v855_v34 = vpop.f32.mrf.mxu1 }
 0x296   :  { %896 = vtanh.f32 %v504_v33 }
 0x29b   :  { %v893_v35 = vpop.eup %892 }
 0x29c   :  { %865 = vmatmul.mubr.msk.f32.vlgmr.msra.gmra.mxu0 %vm49_vm0, %v893_v35 }
 0x29f   :  { %v895_v36 = vpop.eup %894 }
 0x2a0   :  { %868 = vmatmul.mubr.msk.f32.vlgmr.msra.gmra.mxu1 %vm49_vm0, %v895_v36 }
 0x2a1   :  { %870 = vmatprep.mubr.msk.f32.mxu1 %vm927_vm1, %v926_v1 }
 0x2a3   :  { %v897_v37 = vpop.eup %896 }
 0x2a4   :  { %871 = vmatmul.mubr.msk.f32.gmra.mxu1 %vm49_vm0, %v897_v37 }
 0x35c   :  { %v596_v39 = vpop.f32.mrf.mxu0 }
 0x35d   :  { %v597_v40 = vadd.f32 %v711_v38, %v596_v39 }
 0x35e   :  { %v866_v41 = vpop.f32.mrf.mxu0 }
 0x35f   :  { %v612_v42 = vsel %vm49_vm0, %v597_v40, 0.0 }
 0x360   :  { %613 = vadd.xlane.f32.xlu0 %v612_v42  ;;  %v601_v43 = vpop.f32.mrf.mxu1 }
 0x361   :  { %v602_v44 = vadd.f32 %v711_v38, %v601_v43 }
 0x362   :  { %v869_v45 = vpop.f32.mrf.mxu1 }
 0x363   :  { %v615_v46 = vsel %vm49_vm0, %v602_v44, 0.0 }
 0x364   :  { %616 = vadd.xlane.f32.xlu0 %v615_v46  ;;  %v606_v1 = vpop.f32.mrf.mxu1 }
 0x365   :  { %v607_v47 = vadd.f32 %v711_v38, %v606_v1 }
 0x366   :  { %v872_v48 = vpop.f32.mrf.mxu1 }
 0x367   :  { %v618_v49 = vsel %vm49_vm0, %v607_v47, 0.0 }
 0x368   :  { %619 = vadd.xlane.f32.xlu1 %v618_v49 }
 0x3e9   :  { %v614_v50 = vpop.xlane.xlu0 %613 }
 0x3ea   :  { %v622_v51 = vmul.f32 0.03125, %v614_v50 }
 0x3ec   :  { %v625_v52 = vsub.f32 %v597_v40, %v622_v51 }
 0x3ed   :  { %v617_v53 = vpop.xlane.xlu0 %616 }
 0x3ee   :  { %v623_v54 = vmul.f32 0.03125, %v617_v53  ;;  %v628_v58 = vmul.f32 %v625_v52, %v625_v52 }
 0x3f0   :  { %v626_v59 = vsub.f32 %v602_v44, %v623_v54  ;;  %v631_v60 = vsel %vm49_vm0, %v628_v58, 0.0 }
 0x3f1   :  { %632 = vadd.xlane.f32.xlu1 %v631_v60  ;;  %v620_v61 = vpop.xlane.xlu1 %619 }
 0x3f2   :  { %v624_v62 = vmul.f32 0.03125, %v620_v61  ;;  %v629_v63 = vmul.f32 %v626_v59, %v626_v59 }
 0x3f4   :  { %v627_v0 = vsub.f32 %v607_v47, %v624_v62  ;;  %v634_v2 = vsel %vm49_vm0, %v629_v63, 0.0 }
 0x3f5   :  { %635 = vadd.xlane.f32.xlu0 %v634_v2 }
 0x3f6   :  { %v630_v3 = vmul.f32 %v627_v0, %v627_v0 }
 0x3f8   :  { %v637_v4 = vsel %vm49_vm0, %v630_v3, 0.0 }
 0x3f9   :  { %638 = vadd.xlane.f32.xlu1 %v637_v4 }
 0x47a   :  { %v633_v5 = vpop.xlane.xlu1 %632 }
 0x47b   :  { %v640_v6 = vmul.f32 0.03125, %v633_v5 }
 0x47d   :  { %v643_v7 = vadd.f32 1e-05, %v640_v6 }
 0x47e   :  { %v636_v8 = vpop.xlane.xlu0 %635 }
 0x47f   :  { %898 = vrsqrt.f32 %v643_v7  ;;  %v641_v9 = vmul.f32 0.03125, %v636_v8 }
 0x481   :  { %v644_v10 = vadd.f32 1e-05, %v641_v9 }
 0x482   :  { %v639_v11 = vpop.xlane.xlu1 %638 }
 0x483   :  { %900 = vrsqrt.f32 %v644_v10  ;;  %v642_v12 = vmul.f32 0.03125, %v639_v11 }
 0x485   :  { %v645_v13 = vadd.f32 1e-05, %v642_v12 }
 0x487   :  { %902 = vrsqrt.f32 %v645_v13 }
 0x48c   :  { %v899_v14 = vpop.eup %898 }
 0x48d   :  { %v649_v16 = vmul.f32 %v899_v14, %v625_v52 }
 0x48f   :  { %v658_v18 = vmul.f32 %v715_v15, %v649_v16 }
 0x490   :  { %v901_v19 = vpop.eup %900 }
 0x491   :  { %v667_v20 = vadd.f32 %v716_v17, %v658_v18  ;;  %v650_v21 = vmul.f32 %v901_v19, %v626_v59 }
 0x493   :  { %v659_v22 = vmul.f32 %v715_v15, %v650_v21  ;;  %v670_v23 = vadd.f32 %v667_v20, %v1142_v55 }
 0x494   :  { %v903_v24 = vpop.eup %902 }
 0x495   :  { %v668_v25 = vadd.f32 %v716_v17, %v659_v22  ;;  %v651_v26 = vmul.f32 %v903_v24, %v627_v0  ;;  %673 = vst.msk [vmem:[#allocation2] sm:$0xff] %vm49_vm0, %v670_v23 }
 0x497   :  { %v660_v27 = vmul.f32 %v715_v15, %v651_v26  ;;  %v671_v28 = vadd.f32 %v668_v25, %v1151_v56 }
 0x499   :  { %v669_v29 = vadd.f32 %v716_v17, %v660_v27  ;;  %674 = vst.msk [vmem:[#allocation2 + $0x8] sm:$0xff] %vm49_vm0, %v671_v28 }
 0x49b   :  { %v672_v30 = vadd.f32 %v669_v29, %v1160_v57 }
 0x49d   :  { %675 = vst.msk [vmem:[#allocation2 + $0x10] sm:$0xff] %vm49_vm0, %v672_v30 }
 0x49e   :  { %915 = shalt.err (!%p912_p4)
}
 0x49f   :  { %s929_s24 = smov 128   ;;  %s930_s2 = smov 8  }
 0x4a0   :  { %687 = dma.vmem_to_hbm [thread:$0]  %s682_s23, 384, %s1257_s13, [#allocation3], %s929_s24, %s929_s24, %s930_s2  }
 0x4a1   :  { %924 = dma.done.wait [#allocation3], 384  }
 0x4a2   :  { %925 = vsyncadd [#allocation3], 4294966912 }
 0x4a3   :  { %691 = vsyncpa [#allocation3], 1 }

// kernel: message_passing_step.2
= control target key start
LH: loop header
LB: loop body
LE: loop exit
PB: predicated region body
PF: predicated region fallthrough
CT: control target
= control target key end

     0   :  { %vm86_vm0 = vcmask 261120   ;;  %s2742_s4 = inlined_call_operand.vmem [shape: f32[32,32], index: 4, kind: input, shape index: {}]   ;;  %s2743_s1 = inlined_call_operand.vmem [shape: f32[128,32], index: 1, kind: input, shape index: {}]   ;;  %s2744_s3 = inlined_call_operand.vmem [shape: f32[32,32], index: 3, kind: input, shape index: {}]   ;;  %s2745_s5 = inlined_call_operand.vmem [shape: f32[32,32], index: 5, kind: input, shape index: {}]   ;;  %s2746_s0 = inlined_call_operand.vmem [shape: f32[128,32], index: 0, kind: input, shape index: {}]   ;;  %s2747_s2 = inlined_call_operand.vmem [shape: f32[128,32], index: 2, kind: input, shape index: {}]   ;;  %s2748_s7 = inlined_call_operand.vmem [shape: f32[32,32], index: 7, kind: input, shape index: {}]   ;;  %s2749_s9 = inlined_call_operand.vmem [shape: f32[32,32], index: 9, kind: input, shape index: {}]   ;;  %s2750_s6 = inlined_call_operand.vmem [shape: f32[1,32], index: 6, kind: input, shape index: {}]   ;;  %s2751_s8 = inlined_call_operand.vmem [shape: f32[1,32], index: 8, kind: input, shape index: {}]   ;;  %s2752_s10 = inlined_call_operand.vmem [shape: f32[1,32], index: 10, kind: input, shape index: {}]   ;;  %s2753_s11 = inlined_call_operand.vmem [shape: f32[1,32], index: 11, kind: input, shape index: {}]   ;;  %s2754_s12 = inlined_call_operand.vmem [shape: f32[1,32], index: 12, kind: input, shape index: {}]   ;;  %s2755_s13 = inlined_call_operand.vmem [shape: f32[128,32], index: 13, kind: output, shape index: {0}]   ;;  %s2756_s14 = inlined_call_operand.vmem [shape: f32[128,32], index: 14, kind: output, shape index: {1}]  }
   0x1   :  { %v85_v0 = vld [vmem:[%s2742_s4 + $0x18] sm:$0xff]  ;;  %v84_v1 = vld [vmem:[%s2742_s4 + $0x10] sm:$0xff]  ;;  %v83_v2 = vld [vmem:[%s2742_s4 + $0x8] sm:$0xff] }
   0x2   :  { %1821 = vmatprep.subr.mxu1 %v85_v0  ;;  %1661 = vmatprep.subr.mxu0 %v85_v0  ;;  %v82_v3 = vld [vmem:[%s2742_s4] sm:$0xff]  ;;  %v75_v6 = vld [vmem:[%s2743_s1 + $0x48] sm:$0xff]  ;;  %v65_v7 = vld [vmem:[%s2744_s3 + $0x18] sm:$0xff] }
   0x3   :  { %1825 = vmatpush3.msra.mxu1 %v85_v0  ;;  %1662 = vmatpush3.msra.mxu0 %v85_v0  ;;  %v74_v4 = vld [vmem:[%s2743_s1 + $0x40] sm:$0xff]  ;;  %v67_v8 = vld [vmem:[%s2743_s1 + $0x8] sm:$0xff]  ;;  %v492_v9 = vld [vmem:[%s2745_s5 + $0x18] sm:$0xff] }
   0x4   :  { %1822 = vmatprep.subr.mxu1 %v84_v1  ;;  %1663 = vmatprep.subr.mxu0 %v84_v1  ;;  %v66_v5 = vld [vmem:[%s2743_s1] sm:$0xff]  ;;  %v76_v10 = vld [vmem:[%s2743_s1 + $0x50] sm:$0xff]  ;;  %v77_v12 = vld [vmem:[%s2743_s1 + $0x58] sm:$0xff] }
   0x5   :  { %1826 = vmatpush3.msra.mxu1 %v84_v1  ;;  %1664 = vmatpush3.msra.mxu0 %v84_v1  ;;  %v68_v11 = vld [vmem:[%s2743_s1 + $0x10] sm:$0xff]  ;;  %v69_v14 = vld [vmem:[%s2743_s1 + $0x18] sm:$0xff]  ;;  %v78_v16 = vld [vmem:[%s2743_s1 + $0x60] sm:$0xff] }
   0x6   :  { %1823 = vmatprep.subr.mxu1 %v83_v2  ;;  %1665 = vmatprep.subr.mxu0 %v83_v2  ;;  %v64_v13 = vld [vmem:[%s2744_s3 + $0x10] sm:$0xff]  ;;  %v70_v17 = vld [vmem:[%s2743_s1 + $0x20] sm:$0xff]  ;;  %v79_v18 = vld [vmem:[%s2743_s1 + $0x68] sm:$0xff] }
   0x7   :  { %1827 = vmatpush3.msra.mxu1 %v83_v2  ;;  %1666 = vmatpush3.msra.mxu0 %v83_v2  ;;  %v491_v15 = vld [vmem:[%s2745_s5 + $0x10] sm:$0xff]  ;;  %v63_v19 = vld [vmem:[%s2744_s3 + $0x8] sm:$0xff]  ;;  %v81_v24 = vld [vmem:[%s2743_s1 + $0x78] sm:$0xff] }
   0x8   :  { %1824 = vmatprep.subr.mxu1 %v82_v3  ;;  %1667 = vmatprep.subr.mxu0 %v82_v3  ;;  %v71_v20 = vld [vmem:[%s2743_s1 + $0x28] sm:$0xff]  ;;  %v80_v22 = vld [vmem:[%s2743_s1 + $0x70] sm:$0xff]  ;;  %v62_v25 = vld [vmem:[%s2744_s3] sm:$0xff] }
   0x9   :  { %1828 = vmatpush3.msra.mxu1 %v82_v3  ;;  %1681 = vmatprep.mubr.msk.f32.mxu1 %vm86_vm0, %v74_v4  ;;  %v490_v21 = vld [vmem:[%s2745_s5 + $0x8] sm:$0xff]  ;;  %v72_v23 = vld [vmem:[%s2743_s1 + $0x30] sm:$0xff]  ;;  %v73_v26 = vld [vmem:[%s2743_s1 + $0x38] sm:$0xff] }
   0xa   :  { %1668 = vmatpush3.msra.mxu0 %v82_v3  ;;  %1669 = vmatprep.mubr.msk.f32.mxu0 %vm86_vm0, %v66_v5  ;;  %v489_v27 = vld [vmem:[%s2745_s5] sm:$0xff]  ;;  %v47_v30 = vld [vmem:[%s2746_s0 + $0x8] sm:$0xff]  ;;  %v48_v32 = vld [vmem:[%s2746_s0 + $0x10] sm:$0xff] }
   0xb   :  { %1682 = vmatmul.mubr.msk.f32.vlgmr.msra.gmra.mxu1 %vm86_vm0, %v75_v6  ;;  %1693 = vmatprep.subr.mxu1 %v65_v7  ;;  %v46_v28 = vld [vmem:[%s2746_s0] sm:$0xff]  ;;  %v474_v31 = vld [vmem:[%s2747_s2 + $0x8] sm:$0xff]  ;;  %v475_v33 = vld [vmem:[%s2747_s2 + $0x10] sm:$0xff] }
   0xc   :  { %1670 = vmatmul.mubr.msk.f32.vlgmr.msra.gmra.mxu0 %vm86_vm0, %v67_v8  ;;  %1694 = vmatpush3.msra.mxu1 %v65_v7  ;;  %v473_v29 = vld [vmem:[%s2747_s2] sm:$0xff]  ;;  %v49_v34 = vld [vmem:[%s2746_s0 + $0x18] sm:$0xff]  ;;  %v51_v38 = vld [vmem:[%s2746_s0 + $0x28] sm:$0xff] }
   0xd   :  { %1725 = vmatprep.subr.mxu0 %v492_v9  ;;  %1684 = vmatprep.mubr.msk.f32.mxu1 %vm86_vm0, %v76_v10  ;;  %v476_v35 = vld [vmem:[%s2747_s2 + $0x18] sm:$0xff]  ;;  %v50_v36 = vld [vmem:[%s2746_s0 + $0x20] sm:$0xff]  ;;  %v478_v39 = vld [vmem:[%s2747_s2 + $0x28] sm:$0xff] }
   0xe   :  { %1726 = vmatpush3.msra.mxu0 %v492_v9  ;;  %1672 = vmatprep.mubr.msk.f32.mxu0 %vm86_vm0, %v68_v11  ;;  %v477_v37 = vld [vmem:[%s2747_s2 + $0x20] sm:$0xff]  ;;  %v52_v40 = vld [vmem:[%s2746_s0 + $0x30] sm:$0xff]  ;;  %v53_v42 = vld [vmem:[%s2746_s0 + $0x38] sm:$0xff] }
   0xf   :  { %1685 = vmatmul.mubr.msk.f32.gmra.mxu1 %vm86_vm0, %v77_v12  ;;  %1695 = vmatprep.subr.mxu1 %v64_v13  ;;  %v479_v41 = vld [vmem:[%s2747_s2 + $0x30] sm:$0xff]  ;;  %v480_v43 = vld [vmem:[%s2747_s2 + $0x38] sm:$0xff]  ;;  %v54_v44 = vld [vmem:[%s2746_s0 + $0x40] sm:$0xff] }
  0x10   :  { %1673 = vmatmul.mubr.msk.f32.gmra.mxu0 %vm86_vm0, %v69_v14  ;;  %1696 = vmatpush3.msra.mxu1 %v64_v13  ;;  %v481_v45 = vld [vmem:[%s2747_s2 + $0x40] sm:$0xff]  ;;  %v55_v46 = vld [vmem:[%s2746_s0 + $0x48] sm:$0xff]  ;;  %v56_v48 = vld [vmem:[%s2746_s0 + $0x50] sm:$0xff] }
  0x11   :  { %1727 = vmatprep.subr.mxu0 %v491_v15  ;;  %1687 = vmatprep.mubr.msk.f32.mxu1 %vm86_vm0, %v78_v16  ;;  %v482_v47 = vld [vmem:[%s2747_s2 + $0x48] sm:$0xff]  ;;  %v483_v49 = vld [vmem:[%s2747_s2 + $0x50] sm:$0xff]  ;;  %v57_v50 = vld [vmem:[%s2746_s0 + $0x58] sm:$0xff] }
  0x12   :  { %1728 = vmatpush3.msra.mxu0 %v491_v15  ;;  %1675 = vmatprep.mubr.msk.f32.mxu0 %vm86_vm0, %v70_v17  ;;  %v484_v51 = vld [vmem:[%s2747_s2 + $0x58] sm:$0xff]  ;;  %v58_v52 = vld [vmem:[%s2746_s0 + $0x60] sm:$0xff]  ;;  %v59_v54 = vld [vmem:[%s2746_s0 + $0x68] sm:$0xff] }
  0x13   :  { %1688 = vmatmul.mubr.msk.f32.gmra.mxu1 %vm86_vm0, %v79_v18  ;;  %1697 = vmatprep.subr.mxu1 %v63_v19  ;;  %v485_v53 = vld [vmem:[%s2747_s2 + $0x60] sm:$0xff]  ;;  %v486_v55 = vld [vmem:[%s2747_s2 + $0x68] sm:$0xff]  ;;  %v60_v56 = vld [vmem:[%s2746_s0 + $0x70] sm:$0xff] }
  0x14   :  { %1676 = vmatmul.mubr.msk.f32.gmra.mxu0 %vm86_vm0, %v71_v20  ;;  %1698 = vmatpush3.msra.mxu1 %v63_v19  ;;  %v487_v57 = vld [vmem:[%s2747_s2 + $0x70] sm:$0xff]  ;;  %v61_v58 = vld [vmem:[%s2746_s0 + $0x78] sm:$0xff]  ;;  %v742_v62 = vld [vmem:[%s2748_s7 + $0x8] sm:$0xff] }
  0x15   :  { %1729 = vmatprep.subr.mxu0 %v490_v21  ;;  %1690 = vmatprep.mubr.msk.f32.mxu1 %vm86_vm0, %v80_v22  ;;  %v488_v59 = vld [vmem:[%s2747_s2 + $0x78] sm:$0xff]  ;;  %v743_v61 = vld [vmem:[%s2748_s7 + $0x10] sm:$0xff]  ;;  %v741_v63 = vld [vmem:[%s2748_s7] sm:$0xff] }
  0x16   :  { %1730 = vmatpush3.msra.mxu0 %v490_v21  ;;  %1678 = vmatprep.mubr.msk.f32.mxu0 %vm86_vm0, %v72_v23  ;;  %v744_v60 = vld [vmem:[%s2748_s7 + $0x18] sm:$0xff]  ;;  %v963_v1 = vld [vmem:[%s2749_s9 + $0x10] sm:$0xff]  ;;  %v2279_v23 = vld [vmem:[%s2750_s6] ss:$0 sm:$0xff] }
  0x17   :  { %1691 = vmatmul.mubr.msk.f32.gmra.mxu1 %vm86_vm0, %v81_v24  ;;  %1699 = vmatprep.subr.mxu1 %v62_v25  ;;  %v964_v0 = vld [vmem:[%s2749_s9 + $0x18] sm:$0xff] }
  0x18   :  { %1679 = vmatmul.mubr.msk.f32.gmra.mxu0 %vm86_vm0, %v73_v26  ;;  %1700 = vmatpush3.msra.mxu1 %v62_v25 }
  0x19   :  { %1731 = vmatprep.subr.mxu0 %v489_v27  ;;  %1701 = vmatprep.mubr.msk.f32.mxu1 %vm86_vm0, %v46_v28 }
  0x1a   :  { %1732 = vmatpush3.msra.mxu0 %v489_v27  ;;  %1733 = vmatprep.mubr.msk.f32.mxu0 %vm86_vm0, %v473_v29 }
  0x1b   :  { %1702 = vmatmul.mubr.msk.f32.vlgmr.msra.gmra.mxu1 %vm86_vm0, %v47_v30  ;;  %1757 = vmatprep.subr.mxu1 %v744_v60 }
  0x1c   :  { %1734 = vmatmul.mubr.msk.f32.vlgmr.msra.gmra.mxu0 %vm86_vm0, %v474_v31  ;;  %1704 = vmatprep.mubr.msk.f32.mxu1 %vm86_vm0, %v48_v32 }
  0x1d   :  { %1736 = vmatprep.mubr.msk.f32.mxu0 %vm86_vm0, %v475_v33  ;;  %1758 = vmatpush3.msra.mxu1 %v744_v60 }
  0x1e   :  { %1759 = vmatprep.subr.mxu1 %v743_v61  ;;  %1789 = vmatprep.subr.mxu0 %v964_v0 }
  0x1f   :  { %1705 = vmatmul.mubr.msk.f32.gmra.mxu1 %vm86_vm0, %v49_v34  ;;  %1790 = vmatpush3.msra.mxu0 %v964_v0 }
  0x20   :  { %1737 = vmatmul.mubr.msk.f32.gmra.mxu0 %vm86_vm0, %v476_v35  ;;  %1707 = vmatprep.mubr.msk.f32.mxu1 %vm86_vm0, %v50_v36 }
  0x21   :  { %1739 = vmatprep.mubr.msk.f32.mxu0 %vm86_vm0, %v477_v37  ;;  %1760 = vmatpush3.msra.mxu1 %v743_v61 }
  0x22   :  { %1761 = vmatprep.subr.mxu1 %v742_v62  ;;  %1791 = vmatprep.subr.mxu0 %v963_v1 }
  0x23   :  { %1708 = vmatmul.mubr.msk.f32.gmra.mxu1 %vm86_vm0, %v51_v38  ;;  %1792 = vmatpush3.msra.mxu0 %v963_v1 }
  0x24   :  { %1740 = vmatmul.mubr.msk.f32.gmra.mxu0 %vm86_vm0, %v478_v39  ;;  %1710 = vmatprep.mubr.msk.f32.mxu1 %vm86_vm0, %v52_v40 }
  0x25   :  { %1742 = vmatprep.mubr.msk.f32.mxu0 %vm86_vm0, %v479_v41  ;;  %1762 = vmatpush3.msra.mxu1 %v742_v62 }
  0x26   :  { %1763 = vmatprep.subr.mxu1 %v741_v63 }
  0x27   :  { %1711 = vmatmul.mubr.msk.f32.gmra.mxu1 %vm86_vm0, %v53_v42 }
  0x28   :  { %1743 = vmatmul.mubr.msk.f32.gmra.mxu0 %vm86_vm0, %v480_v43  ;;  %1713 = vmatprep.mubr.msk.f32.mxu1 %vm86_vm0, %v54_v44 }
  0x29   :  { %1745 = vmatprep.mubr.msk.f32.mxu0 %vm86_vm0, %v481_v45  ;;  %1764 = vmatpush3.msra.mxu1 %v741_v63 }
  0x2b   :  { %1714 = vmatmul.mubr.msk.f32.gmra.mxu1 %vm86_vm0, %v55_v46 }
  0x2c   :  { %1746 = vmatmul.mubr.msk.f32.gmra.mxu0 %vm86_vm0, %v482_v47  ;;  %1716 = vmatprep.mubr.msk.f32.mxu1 %vm86_vm0, %v56_v48 }
  0x2d   :  { %1748 = vmatprep.mubr.msk.f32.mxu0 %vm86_vm0, %v483_v49 }
  0x2f   :  { %1717 = vmatmul.mubr.msk.f32.gmra.mxu1 %vm86_vm0, %v57_v50 }
  0x30   :  { %1749 = vmatmul.mubr.msk.f32.gmra.mxu0 %vm86_vm0, %v484_v51  ;;  %1719 = vmatprep.mubr.msk.f32.mxu1 %vm86_vm0, %v58_v52 }
  0x31   :  { %1751 = vmatprep.mubr.msk.f32.mxu0 %vm86_vm0, %v485_v53 }
  0x33   :  { %1720 = vmatmul.mubr.msk.f32.gmra.mxu1 %vm86_vm0, %v59_v54 }
  0x34   :  { %1752 = vmatmul.mubr.msk.f32.gmra.mxu0 %vm86_vm0, %v486_v55  ;;  %1722 = vmatprep.mubr.msk.f32.mxu1 %vm86_vm0, %v60_v56 }
  0x35   :  { %1754 = vmatprep.mubr.msk.f32.mxu0 %vm86_vm0, %v487_v57 }
  0x37   :  { %1723 = vmatmul.mubr.msk.f32.gmra.mxu1 %vm86_vm0, %v61_v58 }
  0x38   :  { %1755 = vmatmul.mubr.msk.f32.gmra.mxu0 %vm86_vm0, %v488_v59 }
  0xcb   :  { %v1683_v2 = vpop.f32.mrf.mxu1 }
  0xcc   :  { %v1671_v3 = vpop.f32.mrf.mxu0 }
  0xcd   :  { %v2262_v4 = vpop.f32.mrf.mxu1 }
  0xce   :  { %v201_v5 = vpop.f32.mrf.mxu0 }
  0xcf   :  { %v2264_v6 = vpop.f32.mrf.mxu1 }
  0xd0   :  { %v1674_v7 = vpop.f32.mrf.mxu0 }
  0xd1   :  { %v2266_v8 = vpop.f32.mrf.mxu1 }
  0xd2   :  { %v211_v9 = vpop.f32.mrf.mxu0 }
  0xd3   :  { %v2268_v10 = vpop.f32.mrf.mxu1 }
  0xd4   :  { %v1677_v11 = vpop.f32.mrf.mxu0 }
  0xd5   :  { %v2270_v12 = vpop.f32.mrf.mxu1 }
  0xd6   :  { %v221_v13 = vpop.f32.mrf.mxu0 }
  0xd7   :  { %v2272_v14 = vpop.f32.mrf.mxu1 }
  0xd8   :  { %v1680_v15 = vpop.f32.mrf.mxu0 }
  0xd9   :  { %v2274_v16 = vpop.f32.mrf.mxu1 }
  0xda   :  { %v231_v17 = vpop.f32.mrf.mxu0 }
  0xdb   :  { %v1703_v18 = vpop.f32.mrf.mxu1 }
  0xdc   :  { %v400_v19 = vadd.f32 %v1703_v18, %v1671_v3  ;;  %v1735_v20 = vpop.f32.mrf.mxu0 }
  0xdd   :  { %v394_v21 = vpop.f32.mrf.mxu1 }
  0xde   :  { %v687_v22 = vadd.f32 %v1735_v20, %v400_v19  ;;  %v395_v24 = vadd.f32 %v394_v21, %v201_v5  ;;  %v607_v25 = vpop.f32.mrf.mxu0 }
  0xdf   :  { %v1706_v26 = vpop.f32.mrf.mxu1 }
  0xe0   :  { %v686_v27 = vadd.f32 %v607_v25, %v395_v24  ;;  %v410_v28 = vadd.f32 %v1706_v26, %v1674_v7  ;;  %v1738_v29 = vpop.f32.mrf.mxu0  ;;  %v710_v30 = vadd.f32 %v2279_v23, %v687_v22 }
  0xe1   :  { %v404_v31 = vpop.f32.mrf.mxu1 }
  0xe2   :  { %v709_v32 = vadd.f32 %v2279_v23, %v686_v27  ;;  %v689_v33 = vadd.f32 %v1738_v29, %v410_v28  ;;  %v405_v34 = vadd.f32 %v404_v31, %v211_v9  ;;  %v617_v35 = vpop.f32.mrf.mxu0 }
  0xe3   :  { %v1709_v36 = vpop.f32.mrf.mxu1 }
  0xe4   :  { %1829 = vtanh.f32 %v709_v32  ;;  %v688_v37 = vadd.f32 %v617_v35, %v405_v34  ;;  %v420_v38 = vadd.f32 %v1709_v36, %v1677_v11  ;;  %v1741_v39 = vpop.f32.mrf.mxu0  ;;  %v712_v40 = vadd.f32 %v2279_v23, %v689_v33 }
  0xe5   :  { %1831 = vtanh.f32 %v710_v30  ;;  %v414_v41 = vpop.f32.mrf.mxu1 }
  0xe6   :  { %v711_v42 = vadd.f32 %v2279_v23, %v688_v37  ;;  %v415_v43 = vadd.f32 %v414_v41, %v221_v13  ;;  %v691_v44 = vadd.f32 %v1741_v39, %v420_v38  ;;  %v627_v45 = vpop.f32.mrf.mxu0 }
  0xe7   :  { %v1712_v46 = vpop.f32.mrf.mxu1 }
  0xe8   :  { %1833 = vtanh.f32 %v711_v42  ;;  %v430_v47 = vadd.f32 %v1712_v46, %v1680_v15  ;;  %v690_v48 = vadd.f32 %v627_v45, %v415_v43  ;;  %v1744_v49 = vpop.f32.mrf.mxu0  ;;  %v714_v50 = vadd.f32 %v2279_v23, %v691_v44 }
  0xe9   :  { %1835 = vtanh.f32 %v712_v40  ;;  %v424_v51 = vpop.f32.mrf.mxu1 }
  0xea   :  { %v713_v52 = vadd.f32 %v2279_v23, %v690_v48  ;;  %v425_v53 = vadd.f32 %v424_v51, %v231_v17  ;;  %v693_v54 = vadd.f32 %v1744_v49, %v430_v47  ;;  %v637_v55 = vpop.f32.mrf.mxu0  ;;  %v962_v51 = vld [vmem:[%s2749_s9 + $0x8] sm:$0xff] }
  0xeb   :  { %v1715_v56 = vpop.f32.mrf.mxu1  ;;  %1793 = vmatprep.subr.mxu0 %v962_v51 }
  0xec   :  { %1837 = vtanh.f32 %v713_v52  ;;  %v440_v57 = vadd.f32 %v1715_v56, %v1683_v2  ;;  %v692_v58 = vadd.f32 %v637_v55, %v425_v53  ;;  %v1747_v59 = vpop.f32.mrf.mxu0  ;;  %v716_v60 = vadd.f32 %v2279_v23, %v693_v54  ;;  %1794 = vmatpush3.msra.mxu0 %v962_v51  ;;  %v961_v52 = vld [vmem:[%s2749_s9] sm:$0xff] }
  0xed   :  { %1839 = vtanh.f32 %v714_v50  ;;  %v434_v61 = vpop.f32.mrf.mxu1  ;;  %1795 = vmatprep.subr.mxu0 %v961_v52  ;;  %v1525_v53 = vld [vmem:[%s2751_s8] ss:$0 sm:$0xff] }
  0xee   :  { %v715_v62 = vadd.f32 %v2279_v23, %v692_v58  ;;  %v435_v63 = vadd.f32 %v434_v61, %v2262_v4  ;;  %v695_v0 = vadd.f32 %v1747_v59, %v440_v57  ;;  %v647_v1 = vpop.f32.mrf.mxu0  ;;  %1796 = vmatpush3.msra.mxu0 %v961_v52 }
  0xef   :  { %v1718_v3 = vpop.f32.mrf.mxu1 }
  0xf0   :  { %1841 = vtanh.f32 %v715_v62  ;;  %v450_v5 = vadd.f32 %v1718_v3, %v2264_v6  ;;  %v694_v7 = vadd.f32 %v647_v1, %v435_v63  ;;  %v1750_v9 = vpop.f32.mrf.mxu0  ;;  %v718_v2 = vadd.f32 %v2279_v23, %v695_v0 }
  0xf1   :  { %v1830_v11 = vpop.eup %1829  ;;  %1843 = vtanh.f32 %v716_v60  ;;  %v444_v13 = vpop.f32.mrf.mxu1 }
  0xf2   :  { %v1832_v15 = vpop.eup %1831  ;;  %v717_v17 = vadd.f32 %v2279_v23, %v694_v7  ;;  %v445_v18 = vadd.f32 %v444_v13, %v2266_v8  ;;  %v697_v19 = vadd.f32 %v1750_v9, %v450_v5  ;;  %1765 = vmatprep.mubr.msk.f32.mxu1 %vm86_vm0, %v1830_v11  ;;  %v657_v4 = vpop.f32.mrf.mxu0 }
  0xf3   :  { %v1721_v20 = vpop.f32.mrf.mxu1  ;;  %1766 = vmatmul.mubr.msk.f32.vlgmr.msra.gmra.mxu1 %vm86_vm0, %v1832_v15 }
  0xf4   :  { %1845 = vtanh.f32 %v717_v17  ;;  %v460_v6 = vadd.f32 %v1721_v20, %v2268_v10  ;;  %v696_v21 = vadd.f32 %v657_v4, %v445_v18  ;;  %v1753_v22 = vpop.f32.mrf.mxu0  ;;  %v720_v25 = vadd.f32 %v2279_v23, %v697_v19 }
  0xf5   :  { %v1834_v24 = vpop.eup %1833  ;;  %1847 = vtanh.f32 %v718_v2  ;;  %v454_v26 = vpop.f32.mrf.mxu1 }
  0xf6   :  { %v1836_v27 = vpop.eup %1835  ;;  %v719_v8 = vadd.f32 %v2279_v23, %v696_v21  ;;  %v455_v28 = vadd.f32 %v454_v26, %v2270_v12  ;;  %v699_v29 = vadd.f32 %v1753_v22, %v460_v6  ;;  %1768 = vmatprep.mubr.msk.f32.mxu1 %vm86_vm0, %v1834_v24  ;;  %v667_v30 = vpop.f32.mrf.mxu0 }
  0xf7   :  { %v1724_v31 = vpop.f32.mrf.mxu1  ;;  %1769 = vmatmul.mubr.msk.f32.gmra.mxu1 %vm86_vm0, %v1836_v27 }
  0xf8   :  { %1849 = vtanh.f32 %v719_v8  ;;  %v470_v10 = vadd.f32 %v1724_v31, %v2272_v14  ;;  %v698_v32 = vadd.f32 %v667_v30, %v455_v28  ;;  %v1756_v33 = vpop.f32.mrf.mxu0  ;;  %v722_v35 = vadd.f32 %v2279_v23, %v699_v29 }
  0xf9   :  { %v1838_v34 = vpop.eup %1837  ;;  %1851 = vtanh.f32 %v720_v25  ;;  %v464_v36 = vpop.f32.mrf.mxu1 }
  0xfa   :  { %v1840_v37 = vpop.eup %1839  ;;  %v721_v12 = vadd.f32 %v2279_v23, %v698_v32  ;;  %v465_v38 = vadd.f32 %v464_v36, %v2274_v16  ;;  %v701_v39 = vadd.f32 %v1756_v33, %v470_v10  ;;  %1771 = vmatprep.mubr.msk.f32.mxu1 %vm86_vm0, %v1838_v34  ;;  %v677_v40 = vpop.f32.mrf.mxu0 }
  0xfb   :  { %1772 = vmatmul.mubr.msk.f32.gmra.mxu1 %vm86_vm0, %v1840_v37 }
  0xfc   :  { %1853 = vtanh.f32 %v721_v12  ;;  %v700_v14 = vadd.f32 %v677_v40, %v465_v38  ;;  %v724_v42 = vadd.f32 %v2279_v23, %v701_v39 }
  0xfd   :  { %v1842_v41 = vpop.eup %1841  ;;  %1855 = vtanh.f32 %v722_v35 }
  0xfe   :  { %v1844_v43 = vpop.eup %1843  ;;  %v723_v44 = vadd.f32 %v2279_v23, %v700_v14  ;;  %1774 = vmatprep.mubr.msk.f32.mxu1 %vm86_vm0, %v1842_v41  ;;  %v1542_v14 = vld [vmem:[%s2752_s10] ss:$0 sm:$0xff] }
  0xff   :  { %1775 = vmatmul.mubr.msk.f32.gmra.mxu1 %vm86_vm0, %v1844_v43 }
 0x100   :  { %1857 = vtanh.f32 %v723_v44 }
 0x101   :  { %v1846_v16 = vpop.eup %1845  ;;  %1859 = vtanh.f32 %v724_v42 }
 0x102   :  { %v1848_v45 = vpop.eup %1847  ;;  %1777 = vmatprep.mubr.msk.f32.mxu1 %vm86_vm0, %v1846_v16 }
 0x103   :  { %1778 = vmatmul.mubr.msk.f32.gmra.mxu1 %vm86_vm0, %v1848_v45 }
 0x105   :  { %v1850_v46 = vpop.eup %1849 }
 0x106   :  { %v1852_v47 = vpop.eup %1851  ;;  %1780 = vmatprep.mubr.msk.f32.mxu1 %vm86_vm0, %v1850_v46 }
 0x107   :  { %1781 = vmatmul.mubr.msk.f32.gmra.mxu1 %vm86_vm0, %v1852_v47 }
 0x109   :  { %v1854_v48 = vpop.eup %1853 }
 0x10a   :  { %v1856_v23 = vpop.eup %1855  ;;  %1783 = vmatprep.mubr.msk.f32.mxu1 %vm86_vm0, %v1854_v48 }
 0x10b   :  { %1784 = vmatmul.mubr.msk.f32.gmra.mxu1 %vm86_vm0, %v1856_v23 }
 0x10d   :  { %v1858_v49 = vpop.eup %1857 }
 0x10e   :  { %v1860_v50 = vpop.eup %1859  ;;  %1786 = vmatprep.mubr.msk.f32.mxu1 %vm86_vm0, %v1858_v49 }
 0x10f   :  { %1787 = vmatmul.mubr.msk.f32.gmra.mxu1 %vm86_vm0, %v1860_v50 }
 0x1b3   :  { %v1767_v54 = vpop.f32.mrf.mxu1 }
 0x1b4   :  { %v872_v55 = vadd.f32 %v1767_v54, %v1525_v53 }
 0x1b5   :  { %v866_v56 = vpop.f32.mrf.mxu1 }
 0x1b6   :  { %v867_v57 = vadd.f32 %v1525_v53, %v866_v56 }
 0x1b7   :  { %v1770_v58 = vpop.f32.mrf.mxu1 }
 0x1b8   :  { %1861 = vtanh.f32 %v867_v57  ;;  %v882_v59 = vadd.f32 %v1770_v58, %v1525_v53 }
 0x1b9   :  { %1863 = vtanh.f32 %v872_v55  ;;  %v876_v60 = vpop.f32.mrf.mxu1 }
 0x1ba   :  { %v877_v61 = vadd.f32 %v1525_v53, %v876_v60 }
 0x1bb   :  { %v1773_v62 = vpop.f32.mrf.mxu1 }
 0x1bc   :  { %1865 = vtanh.f32 %v877_v61  ;;  %v892_v63 = vadd.f32 %v1773_v62, %v1525_v53 }
 0x1bd   :  { %1867 = vtanh.f32 %v882_v59  ;;  %v886_v0 = vpop.f32.mrf.mxu1 }
 0x1be   :  { %v887_v1 = vadd.f32 %v1525_v53, %v886_v0 }
 0x1bf   :  { %v1776_v3 = vpop.f32.mrf.mxu1 }
 0x1c0   :  { %1869 = vtanh.f32 %v887_v1  ;;  %v902_v5 = vadd.f32 %v1776_v3, %v1525_v53 }
 0x1c1   :  { %1871 = vtanh.f32 %v892_v63  ;;  %v896_v7 = vpop.f32.mrf.mxu1 }
 0x1c2   :  { %v897_v9 = vadd.f32 %v1525_v53, %v896_v7 }
 0x1c3   :  { %v1779_v11 = vpop.f32.mrf.mxu1 }
 0x1c4   :  { %1873 = vtanh.f32 %v897_v9  ;;  %v912_v13 = vadd.f32 %v1779_v11, %v1525_v53 }
 0x1c5   :  { %v1862_v2 = vpop.eup %1861  ;;  %1875 = vtanh.f32 %v902_v5  ;;  %v906_v15 = vpop.f32.mrf.mxu1 }
 0x1c6   :  { %v1864_v17 = vpop.eup %1863  ;;  %v907_v18 = vadd.f32 %v1525_v53, %v906_v15  ;;  %1797 = vmatprep.mubr.msk.f32.mxu0 %vm86_vm0, %v1862_v2 }
 0x1c7   :  { %v1782_v19 = vpop.f32.mrf.mxu1  ;;  %1798 = vmatmul.mubr.msk.f32.vlgmr.msra.gmra.mxu0 %vm86_vm0, %v1864_v17 }
 0x1c8   :  { %1877 = vtanh.f32 %v907_v18  ;;  %v922_v20 = vadd.f32 %v1782_v19, %v1525_v53 }
 0x1c9   :  { %v1866_v4 = vpop.eup %1865  ;;  %1879 = vtanh.f32 %v912_v13  ;;  %v916_v6 = vpop.f32.mrf.mxu1 }
 0x1ca   :  { %v1868_v21 = vpop.eup %1867  ;;  %v917_v22 = vadd.f32 %v1525_v53, %v916_v6  ;;  %1800 = vmatprep.mubr.msk.f32.mxu0 %vm86_vm0, %v1866_v4 }
 0x1cb   :  { %v1785_v24 = vpop.f32.mrf.mxu1  ;;  %1801 = vmatmul.mubr.msk.f32.gmra.mxu0 %vm86_vm0, %v1868_v21 }
 0x1cc   :  { %1881 = vtanh.f32 %v917_v22  ;;  %v932_v26 = vadd.f32 %v1785_v24, %v1525_v53 }
 0x1cd   :  { %v1870_v25 = vpop.eup %1869  ;;  %1883 = vtanh.f32 %v922_v20  ;;  %v926_v27 = vpop.f32.mrf.mxu1 }
 0x1ce   :  { %v1872_v8 = vpop.eup %1871  ;;  %v927_v28 = vadd.f32 %v1525_v53, %v926_v27  ;;  %1803 = vmatprep.mubr.msk.f32.mxu0 %vm86_vm0, %v1870_v25 }
 0x1cf   :  { %v1788_v29 = vpop.f32.mrf.mxu1  ;;  %1804 = vmatmul.mubr.msk.f32.gmra.mxu0 %vm86_vm0, %v1872_v8 }
 0x1d0   :  { %1885 = vtanh.f32 %v927_v28  ;;  %v942_v31 = vadd.f32 %v1788_v29, %v1525_v53 }
 0x1d1   :  { %v1874_v30 = vpop.eup %1873  ;;  %1887 = vtanh.f32 %v932_v26  ;;  %v936_v10 = vpop.f32.mrf.mxu1 }
 0x1d2   :  { %v1876_v32 = vpop.eup %1875  ;;  %v937_v33 = vadd.f32 %v1525_v53, %v936_v10  ;;  %1806 = vmatprep.mubr.msk.f32.mxu0 %vm86_vm0, %v1874_v30 }
 0x1d3   :  { %1807 = vmatmul.mubr.msk.f32.gmra.mxu0 %vm86_vm0, %v1876_v32 }
 0x1d4   :  { %1889 = vtanh.f32 %v937_v33 }
 0x1d5   :  { %v1878_v34 = vpop.eup %1877  ;;  %1891 = vtanh.f32 %v942_v31 }
 0x1d6   :  { %v1880_v35 = vpop.eup %1879  ;;  %1809 = vmatprep.mubr.msk.f32.mxu0 %vm86_vm0, %v1878_v34 }
 0x1d7   :  { %1810 = vmatmul.mubr.msk.f32.gmra.mxu0 %vm86_vm0, %v1880_v35 }
 0x1d9   :  { %v1882_v36 = vpop.eup %1881 }
 0x1da   :  { %v1884_v37 = vpop.eup %1883  ;;  %1812 = vmatprep.mubr.msk.f32.mxu0 %vm86_vm0, %v1882_v36 }
 0x1db   :  { %1813 = vmatmul.mubr.msk.f32.gmra.mxu0 %vm86_vm0, %v1884_v37 }
 0x1dd   :  { %v1886_v12 = vpop.eup %1885 }
 0x1de   :  { %v1888_v38 = vpop.eup %1887  ;;  %1815 = vmatprep.mubr.msk.f32.mxu0 %vm86_vm0, %v1886_v12 }
 0x1df   :  { %1816 = vmatmul.mubr.msk.f32.gmra.mxu0 %vm86_vm0, %v1888_v38 }
 0x1e1   :  { %v1890_v39 = vpop.eup %1889 }
 0x1e2   :  { %v1892_v40 = vpop.eup %1891  ;;  %1818 = vmatprep.mubr.msk.f32.mxu0 %vm86_vm0, %v1890_v39 }
 0x1e3   :  { %1819 = vmatmul.mubr.msk.f32.gmra.mxu0 %vm86_vm0, %v1892_v40 }
 0x287   :  { %v1799_v41 = vpop.f32.mrf.mxu0 }
 0x288   :  { %v2348_v42 = vadd.f32 %v1799_v41, %v1542_v14 }
 0x289   :  { %v1086_v43 = vpop.f32.mrf.mxu0 }
 0x28a   :  { %v2350_v44 = vadd.f32 %v1542_v14, %v1086_v43  ;;  %v1170_v16 = vsel %vm86_vm0, %v2348_v42, 0.0 }
 0x28b   :  { %1171 = vadd.xlane.f32.xlu0 %v1170_v16  ;;  %v1802_v45 = vpop.f32.mrf.mxu0 }
 0x28c   :  { %v2354_v46 = vadd.f32 %v1802_v45, %v1542_v14  ;;  %v1167_v49 = vsel %vm86_vm0, %v2350_v44, 0.0 }
 0x28d   :  { %v1096_v47 = vpop.f32.mrf.mxu0 }
 0x28e   :  { %v2356_v48 = vadd.f32 %v1542_v14, %v1096_v47  ;;  %v1176_v23 = vsel %vm86_vm0, %v2354_v46, 0.0 }
 0x28f   :  { %1177 = vadd.xlane.f32.xlu1 %v1176_v23  ;;  %v1805_v50 = vpop.f32.mrf.mxu0  ;;  %1168 = vadd.xlane.f32.xlu0 %v1167_v49 }
 0x290   :  { %v2362_v52 = vadd.f32 %v1805_v50, %v1542_v14  ;;  %v1173_v54 = vsel %vm86_vm0, %v2356_v48, 0.0 }
 0x291   :  { %v1106_v51 = vpop.f32.mrf.mxu0 }
 0x292   :  { %v2364_v53 = vadd.f32 %v1542_v14, %v1106_v51  ;;  %v1182_v60 = vsel %vm86_vm0, %v2362_v52, 0.0 }
 0x293   :  { %v1808_v55 = vpop.f32.mrf.mxu0  ;;  %1174 = vadd.xlane.f32.xlu1 %v1173_v54 }
 0x294   :  { %v1179_v56 = vsel %vm86_vm0, %v2364_v53, 0.0  ;;  %v2370_v58 = vadd.f32 %v1808_v55, %v1542_v14 }
 0x295   :  { %v1116_v57 = vpop.f32.mrf.mxu0  ;;  %1180 = vadd.xlane.f32.xlu0 %v1179_v56 }
 0x296   :  { %v2372_v59 = vadd.f32 %v1542_v14, %v1116_v57  ;;  %v1188_v3 = vsel %vm86_vm0, %v2370_v58, 0.0 }
 0x297   :  { %v1811_v61 = vpop.f32.mrf.mxu0  ;;  %1183 = vadd.xlane.f32.xlu1 %v1182_v60 }
 0x298   :  { %v1185_v62 = vsel %vm86_vm0, %v2372_v59, 0.0  ;;  %v2378_v0 = vadd.f32 %v1811_v61, %v1542_v14 }
 0x299   :  { %v1126_v63 = vpop.f32.mrf.mxu0  ;;  %1186 = vadd.xlane.f32.xlu0 %v1185_v62 }
 0x29a   :  { %v2380_v1 = vadd.f32 %v1542_v14, %v1126_v63  ;;  %v1194_v13 = vsel %vm86_vm0, %v2378_v0, 0.0 }
 0x29b   :  { %v1814_v5 = vpop.f32.mrf.mxu0  ;;  %1189 = vadd.xlane.f32.xlu1 %v1188_v3 }
 0x29c   :  { %v1191_v7 = vsel %vm86_vm0, %v2380_v1, 0.0  ;;  %v2386_v11 = vadd.f32 %v1814_v5, %v1542_v14 }
 0x29d   :  { %v1136_v9 = vpop.f32.mrf.mxu0  ;;  %1192 = vadd.xlane.f32.xlu0 %v1191_v7 }
 0x29e   :  { %v2388_v2 = vadd.f32 %v1542_v14, %v1136_v9  ;;  %v1200_v20 = vsel %vm86_vm0, %v2386_v11, 0.0 }
 0x29f   :  { %v1817_v15 = vpop.f32.mrf.mxu0  ;;  %1195 = vadd.xlane.f32.xlu1 %v1194_v13 }
 0x2a0   :  { %v1197_v17 = vsel %vm86_vm0, %v2388_v2, 0.0  ;;  %v2394_v19 = vadd.f32 %v1817_v15, %v1542_v14 }
 0x2a1   :  { %v1146_v18 = vpop.f32.mrf.mxu0  ;;  %1198 = vadd.xlane.f32.xlu0 %v1197_v17 }
 0x2a2   :  { %v2396_v4 = vadd.f32 %v1542_v14, %v1146_v18  ;;  %v1206_v26 = vsel %vm86_vm0, %v2394_v19, 0.0 }
 0x2a3   :  { %v1820_v6 = vpop.f32.mrf.mxu0  ;;  %1201 = vadd.xlane.f32.xlu1 %v1200_v20 }
 0x2a4   :  { %v1203_v21 = vsel %vm86_vm0, %v2396_v4, 0.0  ;;  %v2402_v24 = vadd.f32 %v1820_v6, %v1542_v14 }
 0x2a5   :  { %v1156_v22 = vpop.f32.mrf.mxu0  ;;  %1204 = vadd.xlane.f32.xlu0 %v1203_v21 }
 0x2a6   :  { %v2404_v25 = vadd.f32 %v1542_v14, %v1156_v22  ;;  %v1212_v8 = vsel %vm86_vm0, %v2402_v24, 0.0 }
 0x2a7   :  { %1207 = vadd.xlane.f32.xlu1 %v1206_v26 }
 0x2a8   :  { %v1209_v27 = vsel %vm86_vm0, %v2404_v25, 0.0 }
 0x2a9   :  { %1210 = vadd.xlane.f32.xlu0 %v1209_v27 }
 0x2ab   :  { %1213 = vadd.xlane.f32.xlu1 %v1212_v8 }
 0x314   :  { %v1172_v28 = vpop.xlane.xlu0 %1171 }
 0x315   :  { %v1217_v29 = vmul.f32 0.03125, %v1172_v28 }
 0x317   :  { %v2413_v30 = vsub.f32 %v2348_v42, %v1217_v29 }
 0x318   :  { %v1178_v31 = vpop.xlane.xlu1 %1177  ;;  %v1169_v10 = vpop.xlane.xlu0 %1168 }
 0x319   :  { %v1219_v32 = vmul.f32 0.03125, %v1178_v31  ;;  %v1216_v33 = vmul.f32 0.03125, %v1169_v10  ;;  %v1249_v34 = vmul.f32 %v2413_v30, %v2413_v30 }
 0x31b   :  { %v2418_v35 = vsub.f32 %v2354_v46, %v1219_v32  ;;  %v2421_v36 = vsub.f32 %v2350_v44, %v1216_v33  ;;  %v1267_v37 = vsel %vm86_vm0, %v1249_v34, 0.0 }
 0x31c   :  { %1268 = vadd.xlane.f32.xlu1 %v1267_v37  ;;  %v1175_v12 = vpop.xlane.xlu1 %1174 }
 0x31d   :  { %v1218_v38 = vmul.f32 0.03125, %v1175_v12  ;;  %v1251_v39 = vmul.f32 %v2418_v35, %v2418_v35  ;;  %v1248_v40 = vmul.f32 %v2421_v36, %v2421_v36 }
 0x31e   :  { %v1181_v14 = vpop.xlane.xlu0 %1180 }
 0x31f   :  { %v2429_v41 = vsub.f32 %v2356_v48, %v1218_v38  ;;  %v1220_v42 = vmul.f32 0.03125, %v1181_v14  ;;  %v1273_v43 = vsel %vm86_vm0, %v1251_v39, 0.0  ;;  %v1264_v44 = vsel %vm86_vm0, %v1248_v40, 0.0 }
 0x320   :  { %1274 = vadd.xlane.f32.xlu1 %v1273_v43  ;;  %v1184_v16 = vpop.xlane.xlu1 %1183  ;;  %1265 = vadd.xlane.f32.xlu0 %v1264_v44 }
 0x321   :  { %v2434_v45 = vsub.f32 %v2364_v53, %v1220_v42  ;;  %v1221_v46 = vmul.f32 0.03125, %v1184_v16  ;;  %v1250_v47 = vmul.f32 %v2429_v41, %v2429_v41 }
 0x322   :  { %v1187_v23 = vpop.xlane.xlu0 %1186 }
 0x323   :  { %v2439_v49 = vsub.f32 %v2362_v52, %v1221_v46  ;;  %v1222_v48 = vmul.f32 0.03125, %v1187_v23  ;;  %v1270_v50 = vsel %vm86_vm0, %v1250_v47, 0.0  ;;  %v1252_v51 = vmul.f32 %v2434_v45, %v2434_v45 }
 0x324   :  { %v1190_v54 = vpop.xlane.xlu1 %1189  ;;  %1271 = vadd.xlane.f32.xlu0 %v1270_v50 }
 0x325   :  { %v2445_v55 = vsub.f32 %v2372_v59, %v1222_v48  ;;  %v1223_v53 = vmul.f32 0.03125, %v1190_v54  ;;  %v1253_v56 = vmul.f32 %v2439_v49, %v2439_v49  ;;  %v1276_v60 = vsel %vm86_vm0, %v1252_v51, 0.0 }
 0x326   :  { %v1193_v57 = vpop.xlane.xlu0 %1192 }
 0x327   :  { %v2451_v52 = vsub.f32 %v2370_v58, %v1223_v53  ;;  %v1224_v61 = vmul.f32 0.03125, %v1193_v57  ;;  %v1279_v62 = vsel %vm86_vm0, %v1253_v56, 0.0  ;;  %v1254_v63 = vmul.f32 %v2445_v55, %v2445_v55 }
 0x328   :  { %1280 = vadd.xlane.f32.xlu1 %v1279_v62  ;;  %v1196_v3 = vpop.xlane.xlu1 %1195  ;;  %1277 = vadd.xlane.f32.xlu0 %v1276_v60 }
 0x329   :  { %v2457_v59 = vsub.f32 %v2380_v1, %v1224_v61  ;;  %v1225_v5 = vmul.f32 0.03125, %v1196_v3  ;;  %v1255_v7 = vmul.f32 %v2451_v52, %v2451_v52  ;;  %v1282_v58 = vsel %vm86_vm0, %v1254_v63, 0.0 }
 0x32a   :  { %v1199_v9 = vpop.xlane.xlu0 %1198 }
 0x32b   :  { %v2463_v13 = vsub.f32 %v2378_v0, %v1225_v5  ;;  %v1226_v15 = vmul.f32 0.03125, %v1199_v9  ;;  %v1285_v17 = vsel %vm86_vm0, %v1255_v7, 0.0  ;;  %v1256_v18 = vmul.f32 %v2457_v59, %v2457_v59 }
 0x32c   :  { %1286 = vadd.xlane.f32.xlu1 %v1285_v17  ;;  %v1202_v20 = vpop.xlane.xlu1 %1201  ;;  %1283 = vadd.xlane.f32.xlu0 %v1282_v58 }
 0x32d   :  { %v2469_v1 = vsub.f32 %v2388_v2, %v1226_v15  ;;  %v1227_v6 = vmul.f32 0.03125, %v1202_v20  ;;  %v1257_v21 = vmul.f32 %v2463_v13, %v2463_v13  ;;  %v1288_v0 = vsel %vm86_vm0, %v1256_v18, 0.0  ;;  %v2511_v20 = vld [vmem:[%s2753_s11] ss:$0 sm:$0xff] }
 0x32e   :  { %v1205_v22 = vpop.xlane.xlu0 %1204 }
 0x32f   :  { %v2475_v26 = vsub.f32 %v2386_v11, %v1227_v6  ;;  %v1228_v27 = vmul.f32 0.03125, %v1205_v22  ;;  %v1291_v8 = vsel %vm86_vm0, %v1257_v21, 0.0  ;;  %v1258_v28 = vmul.f32 %v2469_v1, %v2469_v1 }
 0x330   :  { %1292 = vadd.xlane.f32.xlu1 %v1291_v8  ;;  %v1208_v29 = vpop.xlane.xlu1 %1207  ;;  %1289 = vadd.xlane.f32.xlu0 %v1288_v0  ;;  %v2517_v0 = vld [vmem:[%s2754_s12] ss:$0 sm:$0xff] }
 0x331   :  { %v2481_v2 = vsub.f32 %v2396_v4, %v1228_v27  ;;  %v1229_v31 = vmul.f32 0.03125, %v1208_v29  ;;  %v1259_v10 = vmul.f32 %v2475_v26, %v2475_v26  ;;  %v1294_v11 = vsel %vm86_vm0, %v1258_v28, 0.0 }
 0x332   :  { %v1211_v32 = vpop.xlane.xlu0 %1210 }
 0x333   :  { %v2487_v33 = vsub.f32 %v2394_v19, %v1229_v31  ;;  %v1230_v34 = vmul.f32 0.03125, %v1211_v32  ;;  %v1297_v37 = vsel %vm86_vm0, %v1259_v10, 0.0  ;;  %v1260_v12 = vmul.f32 %v2481_v2, %v2481_v2 }
 0x334   :  { %1298 = vadd.xlane.f32.xlu1 %v1297_v37  ;;  %v1214_v38 = vpop.xlane.xlu1 %1213  ;;  %1295 = vadd.xlane.f32.xlu0 %v1294_v11 }
 0x335   :  { %v2493_v4 = vsub.f32 %v2404_v25, %v1230_v34  ;;  %v1231_v39 = vmul.f32 0.03125, %v1214_v38  ;;  %v1261_v40 = vmul.f32 %v2487_v33, %v2487_v33  ;;  %v1300_v42 = vsel %vm86_vm0, %v1260_v12, 0.0 }
 0x337   :  { %v2498_v14 = vsub.f32 %v2402_v24, %v1231_v39  ;;  %v1303_v19 = vsel %vm86_vm0, %v1261_v40, 0.0  ;;  %v1262_v43 = vmul.f32 %v2493_v4, %v2493_v4  ;;  %v1925_v40 = vld [vmem:[%s2746_s0 + $0x8] sm:$0xff] }
 0x338   :  { %1304 = vadd.xlane.f32.xlu1 %v1303_v19  ;;  %1301 = vadd.xlane.f32.xlu0 %v1300_v42 }
 0x339   :  { %v1263_v25 = vmul.f32 %v2498_v14, %v2498_v14  ;;  %v1306_v16 = vsel %vm86_vm0, %v1262_v43, 0.0 }
 0x33b   :  { %v1309_v44 = vsel %vm86_vm0, %v1263_v25, 0.0 }
 0x33c   :  { %1310 = vadd.xlane.f32.xlu1 %v1309_v44  ;;  %1307 = vadd.xlane.f32.xlu0 %v1306_v16 }
 0x3a5   :  { %v1269_v24 = vpop.xlane.xlu1 %1268 }
 0x3a6   :  { %v1313_v46 = vmul.f32 0.03125, %v1269_v24 }
 0x3a8   :  { %v1329_v47 = vadd.f32 1e-05, %v1313_v46 }
 0x3a9   :  { %v1275_v23 = vpop.xlane.xlu1 %1274  ;;  %v1266_v48 = vpop.xlane.xlu0 %1265 }
 0x3aa   :  { %1893 = vrsqrt.f32 %v1329_v47  ;;  %v1315_v50 = vmul.f32 0.03125, %v1275_v23  ;;  %v1312_v51 = vmul.f32 0.03125, %v1266_v48 }
 0x3ac   :  { %v1331_v54 = vadd.f32 1e-05, %v1315_v50  ;;  %v1328_v53 = vadd.f32 1e-05, %v1312_v51  ;;  %v1926_v50 = vld [vmem:[%s2746_s0 + $0x18] sm:$0xff] }
 0x3ad   :  { %v1272_v56 = vpop.xlane.xlu0 %1271 }
 0x3ae   :  { %1895 = vrsqrt.f32 %v1331_v54  ;;  %v1314_v57 = vmul.f32 0.03125, %v1272_v56  ;;  %v1927_v56 = vld [vmem:[%s2746_s0] sm:$0xff] }
 0x3af   :  { %1897 = vrsqrt.f32 %v1328_v53 }
 0x3b0   :  { %v1330_v60 = vadd.f32 1e-05, %v1314_v57 }
 0x3b1   :  { %v1281_v61 = vpop.xlane.xlu1 %1280  ;;  %v1278_v62 = vpop.xlane.xlu0 %1277 }
 0x3b2   :  { %1899 = vrsqrt.f32 %v1330_v60  ;;  %v1317_v63 = vmul.f32 0.03125, %v1281_v61  ;;  %v1316_v3 = vmul.f32 0.03125, %v1278_v62 }
 0x3b4   :  { %v1333_v5 = vadd.f32 1e-05, %v1317_v63  ;;  %v1332_v7 = vadd.f32 1e-05, %v1316_v3 }
 0x3b5   :  { %v1287_v9 = vpop.xlane.xlu1 %1286  ;;  %v1284_v58 = vpop.xlane.xlu0 %1283 }
 0x3b6   :  { %1901 = vrsqrt.f32 %v1333_v5  ;;  %v1319_v15 = vmul.f32 0.03125, %v1287_v9  ;;  %v1318_v17 = vmul.f32 0.03125, %v1284_v58 }
 0x3b7   :  { %v1894_v18 = vpop.eup %1893  ;;  %1903 = vrsqrt.f32 %v1332_v7 }
 0x3b8   :  { %v1361_v6 = vmul.f32 %v1894_v18, %v2413_v30  ;;  %v1335_v21 = vadd.f32 1e-05, %v1319_v15  ;;  %v1334_v22 = vadd.f32 1e-05, %v1318_v17 }
 0x3b9   :  { %v1293_v27 = vpop.xlane.xlu1 %1292  ;;  %v1290_v8 = vpop.xlane.xlu0 %1289 }
 0x3ba   :  { %v1383_v28 = vmul.f32 %v2511_v20, %v1361_v6  ;;  %1905 = vrsqrt.f32 %v1335_v21  ;;  %v1321_v29 = vmul.f32 0.03125, %v1293_v27  ;;  %v1320_v31 = vmul.f32 0.03125, %v1290_v8 }
 0x3bb   :  { %v1896_v10 = vpop.eup %1895  ;;  %1907 = vrsqrt.f32 %v1334_v22 }
 0x3bc   :  { %v1898_v32 = vpop.eup %1897  ;;  %v1405_v11 = vadd.f32 %v2517_v0, %v1383_v28  ;;  %v1363_v30 = vmul.f32 %v1896_v10, %v2418_v35  ;;  %v1337_v34 = vadd.f32 1e-05, %v1321_v29  ;;  %v1336_v37 = vadd.f32 1e-05, %v1320_v31 }
 0x3bd   :  { %v1360_v12 = vmul.f32 %v1898_v32, %v2421_v36  ;;  %v1299_v38 = vpop.xlane.xlu1 %1298  ;;  %v1296_v39 = vpop.xlane.xlu0 %1295  ;;  %v1929_v32 = vld [vmem:[%s2746_s0 + $0x28] sm:$0xff] }
 0x3be   :  { %1421 = vst.msk [vmem:[%s2755_s13 + $0x8] sm:$0xff] %vm86_vm0, %v1405_v11  ;;  %v1437_v19 = vadd.f32 %v1925_v40, %v1405_v11  ;;  %v1385_v42 = vmul.f32 %v2511_v20, %v1363_v30  ;;  %1909 = vrsqrt.f32 %v1337_v34  ;;  %v1323_v35 = vmul.f32 0.03125, %v1299_v38 }
 0x3bf   :  { %v1900_v43 = vpop.eup %1899  ;;  %v1382_v25 = vmul.f32 %v2511_v20, %v1360_v12  ;;  %1911 = vrsqrt.f32 %v1336_v37  ;;  %v1322_v36 = vmul.f32 0.03125, %v1296_v39 }
 0x3c0   :  { %1453 = vst.msk [vmem:[%s2756_s14 + $0x8] sm:$0xff] %vm86_vm0, %v1437_v19  ;;  %v1407_v44 = vadd.f32 %v2517_v0, %v1385_v42  ;;  %v1362_v16 = vmul.f32 %v1900_v43, %v2429_v41  ;;  %v1339_v24 = vadd.f32 1e-05, %v1323_v35  ;;  %v1931_v42 = vld [vmem:[%s2746_s0 + $0x38] sm:$0xff] }
 0x3c1   :  { %v1404_v46 = vadd.f32 %v2517_v0, %v1382_v25  ;;  %v1338_v47 = vadd.f32 1e-05, %v1322_v36  ;;  %v1305_v23 = vpop.xlane.xlu1 %1304  ;;  %v1302_v48 = vpop.xlane.xlu0 %1301 }
 0x3c2   :  { %1423 = vst.msk [vmem:[%s2755_s13 + $0x18] sm:$0xff] %vm86_vm0, %v1407_v44  ;;  %v1439_v51 = vadd.f32 %v1926_v50, %v1407_v44  ;;  %v1384_v54 = vmul.f32 %v2511_v20, %v1362_v16  ;;  %1913 = vrsqrt.f32 %v1339_v24  ;;  %v1325_v41 = vmul.f32 0.03125, %v1305_v23  ;;  %v1933_v23 = vld [vmem:[%s2746_s0 + $0x48] sm:$0xff] }
 0x3c3   :  { %v1902_v53 = vpop.eup %1901  ;;  %1420 = vst.msk [vmem:[%s2755_s13] sm:$0xff] %vm86_vm0, %v1404_v46  ;;  %v1436_v57 = vadd.f32 %v1927_v56, %v1404_v46  ;;  %1915 = vrsqrt.f32 %v1338_v47  ;;  %v1324_v60 = vmul.f32 0.03125, %v1302_v48 }
 0x3c4   :  { %v1904_v61 = vpop.eup %1903  ;;  %1455 = vst.msk [vmem:[%s2756_s14 + $0x18] sm:$0xff] %vm86_vm0, %v1439_v51  ;;  %v1406_v62 = vadd.f32 %v2517_v0, %v1384_v54  ;;  %v1365_v63 = vmul.f32 %v1902_v53, %v2439_v49  ;;  %v1341_v3 = vadd.f32 1e-05, %v1325_v41  ;;  %v1928_v49 = vld [vmem:[%s2746_s0 + $0x10] sm:$0xff] }
 0x3c5   :  { %1452 = vst.msk [vmem:[%s2756_s14] sm:$0xff] %vm86_vm0, %v1436_v57  ;;  %v1364_v5 = vmul.f32 %v1904_v61, %v2434_v45  ;;  %v1340_v7 = vadd.f32 1e-05, %v1324_v60  ;;  %v1311_v9 = vpop.xlane.xlu1 %1310  ;;  %v1308_v58 = vpop.xlane.xlu0 %1307  ;;  %v1935_v61 = vld [vmem:[%s2746_s0 + $0x58] sm:$0xff] }
 0x3c6   :  { %1422 = vst.msk [vmem:[%s2755_s13 + $0x10] sm:$0xff] %vm86_vm0, %v1406_v62  ;;  %v1438_v15 = vadd.f32 %v1928_v49, %v1406_v62  ;;  %v1387_v17 = vmul.f32 %v2511_v20, %v1365_v63  ;;  %1917 = vrsqrt.f32 %v1341_v3  ;;  %v1327_v18 = vmul.f32 0.03125, %v1311_v9 }
 0x3c7   :  { %v1906_v6 = vpop.eup %1905  ;;  %v1386_v45 = vmul.f32 %v2511_v20, %v1364_v5  ;;  %1919 = vrsqrt.f32 %v1340_v7  ;;  %v1326_v21 = vmul.f32 0.03125, %v1308_v58 }
 0x3c8   :  { %v1908_v22 = vpop.eup %1907  ;;  %1454 = vst.msk [vmem:[%s2756_s14 + $0x10] sm:$0xff] %vm86_vm0, %v1438_v15  ;;  %v1409_v27 = vadd.f32 %v2517_v0, %v1387_v17  ;;  %v1367_v8 = vmul.f32 %v1906_v6, %v2451_v52  ;;  %v1343_v28 = vadd.f32 1e-05, %v1327_v18  ;;  %v1937_v17 = vld [vmem:[%s2746_s0 + $0x68] sm:$0xff] }
 0x3c9   :  { %v1408_v29 = vadd.f32 %v2517_v0, %v1386_v45  ;;  %v1366_v31 = vmul.f32 %v1908_v22, %v2445_v55  ;;  %v1342_v10 = vadd.f32 1e-05, %v1326_v21  ;;  %v1930_v55 = vld [vmem:[%s2746_s0 + $0x20] sm:$0xff] }
 0x3ca   :  { %1425 = vst.msk [vmem:[%s2755_s13 + $0x28] sm:$0xff] %vm86_vm0, %v1409_v27  ;;  %v1441_v11 = vadd.f32 %v1929_v32, %v1409_v27  ;;  %v1389_v30 = vmul.f32 %v2511_v20, %v1367_v8  ;;  %1921 = vrsqrt.f32 %v1343_v28  ;;  %v1940_v8 = vld [vmem:[%s2746_s0 + $0x70] sm:$0xff] }
 0x3cb   :  { %v1910_v52 = vpop.eup %1909  ;;  %1424 = vst.msk [vmem:[%s2755_s13 + $0x20] sm:$0xff] %vm86_vm0, %v1408_v29  ;;  %v1440_v34 = vadd.f32 %v1930_v55, %v1408_v29  ;;  %v1388_v37 = vmul.f32 %v2511_v20, %v1366_v31  ;;  %1923 = vrsqrt.f32 %v1342_v10 }
 0x3cc   :  { %v1912_v12 = vpop.eup %1911  ;;  %1457 = vst.msk [vmem:[%s2756_s14 + $0x28] sm:$0xff] %vm86_vm0, %v1441_v11  ;;  %v1411_v38 = vadd.f32 %v2517_v0, %v1389_v30  ;;  %v1369_v39 = vmul.f32 %v1910_v52, %v2463_v13 }
 0x3cd   :  { %1456 = vst.msk [vmem:[%s2756_s14 + $0x20] sm:$0xff] %vm86_vm0, %v1440_v34  ;;  %v1410_v40 = vadd.f32 %v2517_v0, %v1388_v37  ;;  %v1368_v19 = vmul.f32 %v1912_v12, %v2457_v59  ;;  %v1932_v59 = vld [vmem:[%s2746_s0 + $0x30] sm:$0xff] }
 0x3ce   :  { %1427 = vst.msk [vmem:[%s2755_s13 + $0x38] sm:$0xff] %vm86_vm0, %v1411_v38  ;;  %v1443_v35 = vadd.f32 %v1931_v42, %v1411_v38  ;;  %v1391_v13 = vmul.f32 %v2511_v20, %v1369_v39 }
 0x3cf   :  { %v1914_v43 = vpop.eup %1913  ;;  %1426 = vst.msk [vmem:[%s2755_s13 + $0x30] sm:$0xff] %vm86_vm0, %v1410_v40  ;;  %v1442_v25 = vadd.f32 %v1932_v59, %v1410_v40  ;;  %v1390_v36 = vmul.f32 %v2511_v20, %v1368_v19 }
 0x3d0   :  { %v1916_v44 = vpop.eup %1915  ;;  %1459 = vst.msk [vmem:[%s2756_s14 + $0x38] sm:$0xff] %vm86_vm0, %v1443_v35  ;;  %v1413_v16 = vadd.f32 %v2517_v0, %v1391_v13  ;;  %v1371_v24 = vmul.f32 %v1914_v43, %v2475_v26 }
 0x3d1   :  { %1458 = vst.msk [vmem:[%s2756_s14 + $0x30] sm:$0xff] %vm86_vm0, %v1442_v25  ;;  %v1412_v46 = vadd.f32 %v2517_v0, %v1390_v36  ;;  %v1370_v47 = vmul.f32 %v1916_v44, %v2469_v1  ;;  %v1934_v1 = vld [vmem:[%s2746_s0 + $0x40] sm:$0xff] }
 0x3d2   :  { %1429 = vst.msk [vmem:[%s2755_s13 + $0x48] sm:$0xff] %vm86_vm0, %v1413_v16  ;;  %v1445_v48 = vadd.f32 %v1933_v23, %v1413_v16  ;;  %v1393_v26 = vmul.f32 %v2511_v20, %v1371_v24 }
 0x3d3   :  { %v1918_v50 = vpop.eup %1917  ;;  %1428 = vst.msk [vmem:[%s2755_s13 + $0x40] sm:$0xff] %vm86_vm0, %v1412_v46  ;;  %v1444_v51 = vadd.f32 %v1934_v1, %v1412_v46  ;;  %v1392_v54 = vmul.f32 %v2511_v20, %v1370_v47 }
 0x3d4   :  { %v1920_v41 = vpop.eup %1919  ;;  %1461 = vst.msk [vmem:[%s2756_s14 + $0x48] sm:$0xff] %vm86_vm0, %v1445_v48  ;;  %v1415_v53 = vadd.f32 %v2517_v0, %v1393_v26  ;;  %v1373_v56 = vmul.f32 %v1918_v50, %v2487_v33 }
 0x3d5   :  { %1460 = vst.msk [vmem:[%s2756_s14 + $0x40] sm:$0xff] %vm86_vm0, %v1444_v51  ;;  %v1414_v57 = vadd.f32 %v2517_v0, %v1392_v54  ;;  %v1372_v60 = vmul.f32 %v1920_v41, %v2481_v2  ;;  %v1936_v2 = vld [vmem:[%s2746_s0 + $0x50] sm:$0xff] }
 0x3d6   :  { %1431 = vst.msk [vmem:[%s2755_s13 + $0x58] sm:$0xff] %vm86_vm0, %v1415_v53  ;;  %v1447_v62 = vadd.f32 %v1935_v61, %v1415_v53  ;;  %v1395_v33 = vmul.f32 %v2511_v20, %v1373_v56 }
 0x3d7   :  { %v1922_v63 = vpop.eup %1921  ;;  %1430 = vst.msk [vmem:[%s2755_s13 + $0x50] sm:$0xff] %vm86_vm0, %v1414_v57  ;;  %v1446_v3 = vadd.f32 %v1936_v2, %v1414_v57  ;;  %v1394_v5 = vmul.f32 %v2511_v20, %v1372_v60 }
 0x3d8   :  { %v1924_v7 = vpop.eup %1923  ;;  %1463 = vst.msk [vmem:[%s2756_s14 + $0x58] sm:$0xff] %vm86_vm0, %v1447_v62  ;;  %v1417_v9 = vadd.f32 %v2517_v0, %v1395_v33  ;;  %v1375_v58 = vmul.f32 %v1922_v63, %v2498_v14 }
 0x3d9   :  { %1462 = vst.msk [vmem:[%s2756_s14 + $0x50] sm:$0xff] %vm86_vm0, %v1446_v3  ;;  %v1416_v49 = vadd.f32 %v2517_v0, %v1394_v5  ;;  %v1374_v15 = vmul.f32 %v1924_v7, %v2493_v4  ;;  %v1938_v4 = vld [vmem:[%s2746_s0 + $0x60] sm:$0xff] }
 0x3da   :  { %1433 = vst.msk [vmem:[%s2755_s13 + $0x68] sm:$0xff] %vm86_vm0, %v1417_v9  ;;  %v1449_v18 = vadd.f32 %v1937_v17, %v1417_v9  ;;  %v1397_v14 = vmul.f32 %v2511_v20, %v1375_v58 }
 0x3db   :  { %1432 = vst.msk [vmem:[%s2755_s13 + $0x60] sm:$0xff] %vm86_vm0, %v1416_v49  ;;  %v1448_v6 = vadd.f32 %v1938_v4, %v1416_v49  ;;  %v1396_v45 = vmul.f32 %v2511_v20, %v1374_v15  ;;  %v1939_v20 = vld [vmem:[%s2746_s0 + $0x78] sm:$0xff] }
 0x3dc   :  { %1465 = vst.msk [vmem:[%s2756_s14 + $0x68] sm:$0xff] %vm86_vm0, %v1449_v18  ;;  %v1419_v21 = vadd.f32 %v2517_v0, %v1397_v14 }
 0x3dd   :  { %1464 = vst.msk [vmem:[%s2756_s14 + $0x60] sm:$0xff] %vm86_vm0, %v1448_v6  ;;  %v1418_v22 = vadd.f32 %v2517_v0, %v1396_v45 }
 0x3de   :  { %1435 = vst.msk [vmem:[%s2755_s13 + $0x78] sm:$0xff] %vm86_vm0, %v1419_v21  ;;  %v1451_v27 = vadd.f32 %v1939_v20, %v1419_v21 }
 0x3df   :  { %1434 = vst.msk [vmem:[%s2755_s13 + $0x70] sm:$0xff] %vm86_vm0, %v1418_v22  ;;  %v1450_v0 = vadd.f32 %v1940_v8, %v1418_v22 }
 0x3e0   :  { %1467 = vst.msk [vmem:[%s2756_s14 + $0x78] sm:$0xff] %vm86_vm0, %v1451_v27 }
 0x3e1   :  { %1466 = vst.msk [vmem:[%s2756_s14 + $0x70] sm:$0xff] %vm86_vm0, %v1450_v0 }

</bundles_post_ra>
